<compile_context>
chip_gen: v6e
topology: v6e:2x2x1
jax: 0.10.0
libtpu: 0.0.40
codegen_flags: <defaults>
</compile_context>

<pallas_src>
import numpy as np

import jax
import jax.numpy as jnp
from jax import lax
from jax.experimental import pallas as pl
from jax.experimental.pallas import tpu as pltpu


# ---------------------------------------------------------------------------
# Fused forward kernel: one image per grid step, everything stays in VMEM.
#
# Activation layout inside the kernel ("fused lane" layout):
#   conv1 out  z1 : (14, 224)  rows = out height, lane = cout*14 + out_width
#   conv2 out  z2 : (7, 224)   rows = out height, lane = cout*7  + out_width
# ---------------------------------------------------------------------------
def _convnet_kernel(x_ref, b1_ref, sh1_ref, bias1_ref, b2_ref, sh2_ref,
                    bias2_ref, gfc_ref, fcb_ref, o_ref):
    f32 = jnp.float32

    # ---- conv1: 3->16, k3 s2 p1, bias, ReLU -------------------------------
    # p[h, co*14+ow]  = sum_{cin,kw} w1[co,cin,kh,kw] * xpad[cin, h, 2ow+kw-1]
    # acc1[oh, lane]  = sum_kh p_kh[2oh+kh-1, lane]   (0/1 row-select matmul)
    acc1 = None
    for kh in range(3):
        p = None
        for c in range(3):
            t = jnp.dot(x_ref[0, c], b1_ref[c, kh], preferred_element_type=f32)
            p = t if p is None else p + t                          # (28, 224)
        s = jnp.dot(sh1_ref[kh], p, preferred_element_type=f32)    # (14, 224)
        acc1 = s if acc1 is None else acc1 + s
    z1 = jnp.maximum(acc1 + bias1_ref[...], 0.0)                   # (14, 224)

    # ---- conv2: 16->32, k3 s2 p1, bias, ReLU ------------------------------
    acc2 = None
    for kh in range(3):
        p2 = jnp.dot(z1, b2_ref[kh], preferred_element_type=f32)   # (14, 224)
        s2 = jnp.dot(sh2_ref[kh], p2, preferred_element_type=f32)  # (7, 224)
        acc2 = s2 if acc2 is None else acc2 + s2
    z2 = jnp.maximum(acc2 + bias2_ref[...], 0.0)                   # (7, 224)

    # ---- adaptive-avg-pool(1) + fc + sigmoid (pool folded into the GEMM) ---
    t = jnp.dot(z2, gfc_ref[...], preferred_element_type=f32)      # (7, 10)
    logits = jnp.sum(t, axis=0, keepdims=True) + fcb_ref[...]      # (1, 10)
    o_ref[...] = jax.nn.sigmoid(logits)[None, :, :].astype(o_ref.dtype)


# ---------------------------------------------------------------------------
# One-time weight preprocessing (pure JAX, outside the hot path).
# ---------------------------------------------------------------------------
def _w_select(win, wo):
    """sel[kw, w, ow] = 1.0 iff w == 2*ow + kw - 1 (stride 2, pad 1, k 3)."""
    w = jnp.arange(win)
    ow = jnp.arange(wo)
    kw = jnp.arange(3)
    return (w[None, :, None] == (2 * ow[None, None, :] + kw[:, None, None] - 1)
            ).astype(jnp.float32)                                  # (3, win, wo)


def _h_select(hin, ho):
    """sh[kh, oh, h] = 1.0 iff h == 2*oh + kh - 1 (rows gathered by the MXU)."""
    h = jnp.arange(hin)
    oh = jnp.arange(ho)
    kh = jnp.arange(3)
    return (h[None, None, :] == (2 * oh[None, :, None] + kh[:, None, None] - 1)
            ).astype(jnp.float32)                                  # (3, ho, hin)


def _conv_weight_matrix(w_oihw, win, wo):
    """B[cin, kh, w, cout, ow] = sum_kw w[cout,cin,kh,kw] * [w == 2ow+kw-1]."""
    sel = _w_select(win, wo)                                       # (3, win, wo)
    return jnp.einsum("oikl,lwz->ikwoz", w_oihw.astype(jnp.float32), sel)


def prepare_params(params):
    b1 = _conv_weight_matrix(params["conv1_w"], 28, 14)            # (3,3,28,16,14)
    b2 = _conv_weight_matrix(params["conv2_w"], 14, 7)             # (16,3,14,32,7)
    return {
        "b1": b1.reshape(3, 3, 28, 16 * 14),                       # [cin, kh, w, lane]
        "sh1": _h_select(28, 14),                                  # (3, 14, 28)
        "bias1": jnp.repeat(params["conv1_b"].astype(jnp.float32), 14)[None, :],
        "b2": b2.transpose(1, 0, 2, 3, 4).reshape(3, 16 * 14, 32 * 7),  # [kh, cin*14+w, lane]
        "sh2": _h_select(14, 7),                                   # (3, 7, 14)
        "bias2": jnp.repeat(params["conv2_b"].astype(jnp.float32), 7)[None, :],
        # global-avg-pool (1/49) folded into the fc weight, repeated per ow.
        "gfc": jnp.repeat(params["fc_w"].astype(jnp.float32) / 49.0, 7, axis=0),
        "fcb": params["fc_b"].astype(jnp.float32)[None, :],        # (1, 10)
    }


# ---------------------------------------------------------------------------
# Entry point: one fused pallas_call, grid over the batch.
# ---------------------------------------------------------------------------
@jax.jit
def convnet_forward(x_nchw, prep):
    n = x_nchw.shape[0]

    flops = 2 * n * (9 * 28 * 28 * 224 + 3 * 14 * 28 * 224
                     + 3 * 14 * 224 * 224 + 3 * 7 * 14 * 224 + 7 * 224 * 10)
    w_bytes = sum(int(np.prod(v.shape)) * v.dtype.itemsize for v in prep.values())
    bytes_accessed = n * 3 * 28 * 28 * 4 + w_bytes + n * 10 * 4

    out = pl.pallas_call(
        _convnet_kernel,
        out_shape=jax.ShapeDtypeStruct((n, 1, 10), jnp.float32),
        grid=(n,),
        in_specs=[
            pl.BlockSpec((1, 3, 28, 28), lambda i: (i, 0, 0, 0)),   # image i (NCHW)
            pl.BlockSpec((3, 3, 28, 224), lambda i: (0, 0, 0, 0)),  # conv1 GEMM weight
            pl.BlockSpec((3, 14, 28), lambda i: (0, 0, 0)),         # conv1 row select
            pl.BlockSpec((1, 224), lambda i: (0, 0)),               # conv1 bias row
            pl.BlockSpec((3, 224, 224), lambda i: (0, 0, 0)),       # conv2 GEMM weight
            pl.BlockSpec((3, 7, 14), lambda i: (0, 0, 0)),          # conv2 row select
            pl.BlockSpec((1, 224), lambda i: (0, 0)),               # conv2 bias row
            pl.BlockSpec((224, 10), lambda i: (0, 0)),              # pool+fc weight
            pl.BlockSpec((1, 10), lambda i: (0, 0)),                # fc bias
        ],
        out_specs=pl.BlockSpec((1, 1, 10), lambda i: (i, 0, 0)),
        compiler_params=pltpu.CompilerParams(
            dimension_semantics=("parallel",)),
        cost_estimate=pl.CostEstimate(
            flops=flops, transcendentals=10 * n, bytes_accessed=bytes_accessed),
    )(x_nchw, prep["b1"], prep["sh1"], prep["bias1"], prep["b2"],
      prep["sh2"], prep["bias2"], prep["gfc"], prep["fcb"])
    return out[:, 0, :]                                            # (N, 10)


# ---------------------------------------------------------------------------
# Pure-JAX reference for the correctness check.
# ---------------------------------------------------------------------------
def reference(x_nchw, params):
    y = lax.conv_general_dilated(
        x_nchw, params["conv1_w"], (2, 2), ((1, 1), (1, 1)),
        dimension_numbers=("NCHW", "OIHW", "NCHW"))
    y = jax.nn.relu(y + params["conv1_b"][None, :, None, None])
    y = lax.conv_general_dilated(
        y, params["conv2_w"], (2, 2), ((1, 1), (1, 1)),
        dimension_numbers=("NCHW", "OIHW", "NCHW"))
    y = jax.nn.relu(y + params["conv2_b"][None, :, None, None])
    p = jnp.mean(y, axis=(2, 3))
    return jax.nn.sigmoid(p @ params["fc_w"] + params["fc_b"])


if __name__ == "__main__":
    key = jax.random.PRNGKey(0)
    kx, k1, k2, k3, k4, k5, k6 = jax.random.split(key, 7)

    # batch=2, ConvNet expects 3x28x28 NCHW inputs (PyTorch convention).
    x = jax.random.normal(kx, (2, 3, 28, 28), jnp.float32)

    # Synthetic parameters with the shapes from ConvNet.__init__.
    # fc weight is stored pre-transposed as (in=32, out=10): y = x @ W + b
    # (transpose torch's Linear.weight when importing a real checkpoint).
    params = {
        "conv1_w": jax.random.normal(k1, (16, 3, 3, 3), jnp.float32) * 0.1,
        "conv1_b": jax.random.normal(k2, (16,), jnp.float32) * 0.1,
        "conv2_w": jax.random.normal(k3, (32, 16, 3, 3), jnp.float32) * 0.1,
        "conv2_b": jax.random.normal(k4, (32,), jnp.float32) * 0.1,
        "fc_w": jax.random.normal(k5, (32, 10), jnp.float32) * 0.1,
        "fc_b": jax.random.normal(k6, (10,), jnp.float32) * 0.1,
    }

    prep = prepare_params(params)   # one-time weight folding, not in the hot path

    out = jax.block_until_ready(convnet_forward(x, prep))
    ref = jax.block_until_ready(reference(x, params))

    assert out.shape == (2, 10), out.shape
    np.testing.assert_allclose(np.asarray(out), np.asarray(ref),
                               rtol=5e-4, atol=5e-4)
    print("KERNEL_OK")
</pallas_src>

<mosaic_0001>
module attributes {stable_mosaic.version = 11 : i64} {
  func.func @_convnet_kernel(%arg0: i32, %arg1: memref<1x3x28x28xf32, #tpu.memory_space<vmem>>, %arg2: memref<3x3x28x224xf32, #tpu.memory_space<vmem>>, %arg3: memref<3x14x28xf32, #tpu.memory_space<vmem>>, %arg4: memref<1x224xf32, #tpu.memory_space<vmem>>, %arg5: memref<3x224x224xf32, #tpu.memory_space<vmem>>, %arg6: memref<3x7x14xf32, #tpu.memory_space<vmem>>, %arg7: memref<1x224xf32, #tpu.memory_space<vmem>>, %arg8: memref<224x10xf32, #tpu.memory_space<vmem>>, %arg9: memref<1x10xf32, #tpu.memory_space<vmem>>, %arg10: memref<1x1x10xf32, #tpu.memory_space<vmem>>) attributes {dimension_semantics = [#tpu.dimension_semantics<parallel>], iteration_bounds = array<i64: 2>, scalar_prefetch = 0 : i64, scratch_operands = 0 : i64, tpu.core_type = #tpu.core_type<tc>, window_params = [{transform_indices = @transform_0, window_bounds = array<i64: 1, 3, 28, 28>}, {pipeline_mode = #tpu.pipeline_mode<synchronous>, transform_indices = @transform_1, window_bounds = array<i64: 3, 3, 28, 224>}, {pipeline_mode = #tpu.pipeline_mode<synchronous>, transform_indices = @transform_2, window_bounds = array<i64: 3, 14, 28>}, {pipeline_mode = #tpu.pipeline_mode<synchronous>, transform_indices = @transform_3, window_bounds = array<i64: 1, 224>}, {pipeline_mode = #tpu.pipeline_mode<synchronous>, transform_indices = @transform_4, window_bounds = array<i64: 3, 224, 224>}, {pipeline_mode = #tpu.pipeline_mode<synchronous>, transform_indices = @transform_5, window_bounds = array<i64: 3, 7, 14>}, {pipeline_mode = #tpu.pipeline_mode<synchronous>, transform_indices = @transform_6, window_bounds = array<i64: 1, 224>}, {pipeline_mode = #tpu.pipeline_mode<synchronous>, transform_indices = @transform_7, window_bounds = array<i64: 224, 10>}, {pipeline_mode = #tpu.pipeline_mode<synchronous>, transform_indices = @transform_8, window_bounds = array<i64: 1, 10>}, {transform_indices = @transform_9, window_bounds = array<i64: 1, 1, 10>}]} {
    %c0 = arith.constant 0 : index
    %c0_0 = arith.constant 0 : index
    %c0_1 = arith.constant 0 : index
    %c0_2 = arith.constant 0 : index
    %0 = vector.load %arg1[%c0, %c0_0, %c0_1, %c0_2] : memref<1x3x28x28xf32, #tpu.memory_space<vmem>>, vector<1x1x28x28xf32>
    %1 = vector.shape_cast %0 : vector<1x1x28x28xf32> to vector<28x28xf32>
    %c0_3 = arith.constant 0 : index
    %c0_4 = arith.constant 0 : index
    %c0_5 = arith.constant 0 : index
    %c0_6 = arith.constant 0 : index
    %2 = vector.load %arg2[%c0_3, %c0_4, %c0_5, %c0_6] : memref<3x3x28x224xf32, #tpu.memory_space<vmem>>, vector<1x1x28x224xf32>
    %3 = vector.shape_cast %2 : vector<1x1x28x224xf32> to vector<28x224xf32>
    %cst = arith.constant dense<0.000000e+00> : vector<28x224xf32>
    %4 = tpu.matmul %1, %3, %cst {dimension_numbers = #tpu.dot_dimension_numbers<[1], [0], [0], [1], [0, 0, 1, 1], [], []>} : vector<28x28xf32>, vector<28x224xf32>, vector<28x224xf32> -> vector<28x224xf32>
    %c0_7 = arith.constant 0 : index
    %c1 = arith.constant 1 : index
    %c0_8 = arith.constant 0 : index
    %c0_9 = arith.constant 0 : index
    %5 = vector.load %arg1[%c0_7, %c1, %c0_8, %c0_9] : memref<1x3x28x28xf32, #tpu.memory_space<vmem>>, vector<1x1x28x28xf32>
    %6 = vector.shape_cast %5 : vector<1x1x28x28xf32> to vector<28x28xf32>
    %c1_10 = arith.constant 1 : index
    %c0_11 = arith.constant 0 : index
    %c0_12 = arith.constant 0 : index
    %c0_13 = arith.constant 0 : index
    %7 = vector.load %arg2[%c1_10, %c0_11, %c0_12, %c0_13] : memref<3x3x28x224xf32, #tpu.memory_space<vmem>>, vector<1x1x28x224xf32>
    %8 = vector.shape_cast %7 : vector<1x1x28x224xf32> to vector<28x224xf32>
    %cst_14 = arith.constant dense<0.000000e+00> : vector<28x224xf32>
    %9 = tpu.matmul %6, %8, %cst_14 {dimension_numbers = #tpu.dot_dimension_numbers<[1], [0], [0], [1], [0, 0, 1, 1], [], []>} : vector<28x28xf32>, vector<28x224xf32>, vector<28x224xf32> -> vector<28x224xf32>
    %10 = arith.addf %4, %9 : vector<28x224xf32>
    %c0_15 = arith.constant 0 : index
    %c2 = arith.constant 2 : index
    %c0_16 = arith.constant 0 : index
    %c0_17 = arith.constant 0 : index
    %11 = vector.load %arg1[%c0_15, %c2, %c0_16, %c0_17] : memref<1x3x28x28xf32, #tpu.memory_space<vmem>>, vector<1x1x28x28xf32>
    %12 = vector.shape_cast %11 : vector<1x1x28x28xf32> to vector<28x28xf32>
    %c2_18 = arith.constant 2 : index
    %c0_19 = arith.constant 0 : index
    %c0_20 = arith.constant 0 : index
    %c0_21 = arith.constant 0 : index
    %13 = vector.load %arg2[%c2_18, %c0_19, %c0_20, %c0_21] : memref<3x3x28x224xf32, #tpu.memory_space<vmem>>, vector<1x1x28x224xf32>
    %14 = vector.shape_cast %13 : vector<1x1x28x224xf32> to vector<28x224xf32>
    %cst_22 = arith.constant dense<0.000000e+00> : vector<28x224xf32>
    %15 = tpu.matmul %12, %14, %cst_22 {dimension_numbers = #tpu.dot_dimension_numbers<[1], [0], [0], [1], [0, 0, 1, 1], [], []>} : vector<28x28xf32>, vector<28x224xf32>, vector<28x224xf32> -> vector<28x224xf32>
    %16 = arith.addf %10, %15 : vector<28x224xf32>
    %c0_23 = arith.constant 0 : index
    %c0_24 = arith.constant 0 : index
    %c0_25 = arith.constant 0 : index
    %17 = vector.load %arg3[%c0_23, %c0_24, %c0_25] : memref<3x14x28xf32, #tpu.memory_space<vmem>>, vector<1x14x28xf32>
    %18 = vector.shape_cast %17 : vector<1x14x28xf32> to vector<14x28xf32>
    %cst_26 = arith.constant dense<0.000000e+00> : vector<14x224xf32>
    %19 = tpu.matmul %18, %16, %cst_26 {dimension_numbers = #tpu.dot_dimension_numbers<[1], [0], [0], [1], [0, 0, 1, 1], [], []>} : vector<14x28xf32>, vector<28x224xf32>, vector<14x224xf32> -> vector<14x224xf32>
    %c0_27 = arith.constant 0 : index
    %c0_28 = arith.constant 0 : index
    %c0_29 = arith.constant 0 : index
    %c0_30 = arith.constant 0 : index
    %20 = vector.load %arg1[%c0_27, %c0_28, %c0_29, %c0_30] : memref<1x3x28x28xf32, #tpu.memory_space<vmem>>, vector<1x1x28x28xf32>
    %21 = vector.shape_cast %20 : vector<1x1x28x28xf32> to vector<28x28xf32>
    %c0_31 = arith.constant 0 : index
    %c1_32 = arith.constant 1 : index
    %c0_33 = arith.constant 0 : index
    %c0_34 = arith.constant 0 : index
    %22 = vector.load %arg2[%c0_31, %c1_32, %c0_33, %c0_34] : memref<3x3x28x224xf32, #tpu.memory_space<vmem>>, vector<1x1x28x224xf32>
    %23 = vector.shape_cast %22 : vector<1x1x28x224xf32> to vector<28x224xf32>
    %cst_35 = arith.constant dense<0.000000e+00> : vector<28x224xf32>
    %24 = tpu.matmul %21, %23, %cst_35 {dimension_numbers = #tpu.dot_dimension_numbers<[1], [0], [0], [1], [0, 0, 1, 1], [], []>} : vector<28x28xf32>, vector<28x224xf32>, vector<28x224xf32> -> vector<28x224xf32>
    %c0_36 = arith.constant 0 : index
    %c1_37 = arith.constant 1 : index
    %c0_38 = arith.constant 0 : index
    %c0_39 = arith.constant 0 : index
    %25 = vector.load %arg1[%c0_36, %c1_37, %c0_38, %c0_39] : memref<1x3x28x28xf32, #tpu.memory_space<vmem>>, vector<1x1x28x28xf32>
    %26 = vector.shape_cast %25 : vector<1x1x28x28xf32> to vector<28x28xf32>
    %c1_40 = arith.constant 1 : index
    %c1_41 = arith.constant 1 : index
    %c0_42 = arith.constant 0 : index
    %c0_43 = arith.constant 0 : index
    %27 = vector.load %arg2[%c1_40, %c1_41, %c0_42, %c0_43] : memref<3x3x28x224xf32, #tpu.memory_space<vmem>>, vector<1x1x28x224xf32>
    %28 = vector.shape_cast %27 : vector<1x1x28x224xf32> to vector<28x224xf32>
    %cst_44 = arith.constant dense<0.000000e+00> : vector<28x224xf32>
    %29 = tpu.matmul %26, %28, %cst_44 {dimension_numbers = #tpu.dot_dimension_numbers<[1], [0], [0], [1], [0, 0, 1, 1], [], []>} : vector<28x28xf32>, vector<28x224xf32>, vector<28x224xf32> -> vector<28x224xf32>
    %30 = arith.addf %24, %29 : vector<28x224xf32>
    %c0_45 = arith.constant 0 : index
    %c2_46 = arith.constant 2 : index
    %c0_47 = arith.constant 0 : index
    %c0_48 = arith.constant 0 : index
    %31 = vector.load %arg1[%c0_45, %c2_46, %c0_47, %c0_48] : memref<1x3x28x28xf32, #tpu.memory_space<vmem>>, vector<1x1x28x28xf32>
    %32 = vector.shape_cast %31 : vector<1x1x28x28xf32> to vector<28x28xf32>
    %c2_49 = arith.constant 2 : index
    %c1_50 = arith.constant 1 : index
    %c0_51 = arith.constant 0 : index
    %c0_52 = arith.constant 0 : index
    %33 = vector.load %arg2[%c2_49, %c1_50, %c0_51, %c0_52] : memref<3x3x28x224xf32, #tpu.memory_space<vmem>>, vector<1x1x28x224xf32>
    %34 = vector.shape_cast %33 : vector<1x1x28x224xf32> to vector<28x224xf32>
    %cst_53 = arith.constant dense<0.000000e+00> : vector<28x224xf32>
    %35 = tpu.matmul %32, %34, %cst_53 {dimension_numbers = #tpu.dot_dimension_numbers<[1], [0], [0], [1], [0, 0, 1, 1], [], []>} : vector<28x28xf32>, vector<28x224xf32>, vector<28x224xf32> -> vector<28x224xf32>
    %36 = arith.addf %30, %35 : vector<28x224xf32>
    %c1_54 = arith.constant 1 : index
    %c0_55 = arith.constant 0 : index
    %c0_56 = arith.constant 0 : index
    %37 = vector.load %arg3[%c1_54, %c0_55, %c0_56] : memref<3x14x28xf32, #tpu.memory_space<vmem>>, vector<1x14x28xf32>
    %38 = vector.shape_cast %37 : vector<1x14x28xf32> to vector<14x28xf32>
    %cst_57 = arith.constant dense<0.000000e+00> : vector<14x224xf32>
    %39 = tpu.matmul %38, %36, %cst_57 {dimension_numbers = #tpu.dot_dimension_numbers<[1], [0], [0], [1], [0, 0, 1, 1], [], []>} : vector<14x28xf32>, vector<28x224xf32>, vector<14x224xf32> -> vector<14x224xf32>
    %40 = arith.addf %19, %39 : vector<14x224xf32>
    %c0_58 = arith.constant 0 : index
    %c0_59 = arith.constant 0 : index
    %c0_60 = arith.constant 0 : index
    %c0_61 = arith.constant 0 : index
    %41 = vector.load %arg1[%c0_58, %c0_59, %c0_60, %c0_61] : memref<1x3x28x28xf32, #tpu.memory_space<vmem>>, vector<1x1x28x28xf32>
    %42 = vector.shape_cast %41 : vector<1x1x28x28xf32> to vector<28x28xf32>
    %c0_62 = arith.constant 0 : index
    %c2_63 = arith.constant 2 : index
    %c0_64 = arith.constant 0 : index
    %c0_65 = arith.constant 0 : index
    %43 = vector.load %arg2[%c0_62, %c2_63, %c0_64, %c0_65] : memref<3x3x28x224xf32, #tpu.memory_space<vmem>>, vector<1x1x28x224xf32>
    %44 = vector.shape_cast %43 : vector<1x1x28x224xf32> to vector<28x224xf32>
    %cst_66 = arith.constant dense<0.000000e+00> : vector<28x224xf32>
    %45 = tpu.matmul %42, %44, %cst_66 {dimension_numbers = #tpu.dot_dimension_numbers<[1], [0], [0], [1], [0, 0, 1, 1], [], []>} : vector<28x28xf32>, vector<28x224xf32>, vector<28x224xf32> -> vector<28x224xf32>
    %c0_67 = arith.constant 0 : index
    %c1_68 = arith.constant 1 : index
    %c0_69 = arith.constant 0 : index
    %c0_70 = arith.constant 0 : index
    %46 = vector.load %arg1[%c0_67, %c1_68, %c0_69, %c0_70] : memref<1x3x28x28xf32, #tpu.memory_space<vmem>>, vector<1x1x28x28xf32>
    %47 = vector.shape_cast %46 : vector<1x1x28x28xf32> to vector<28x28xf32>
    %c1_71 = arith.constant 1 : index
    %c2_72 = arith.constant 2 : index
    %c0_73 = arith.constant 0 : index
    %c0_74 = arith.constant 0 : index
    %48 = vector.load %arg2[%c1_71, %c2_72, %c0_73, %c0_74] : memref<3x3x28x224xf32, #tpu.memory_space<vmem>>, vector<1x1x28x224xf32>
    %49 = vector.shape_cast %48 : vector<1x1x28x224xf32> to vector<28x224xf32>
    %cst_75 = arith.constant dense<0.000000e+00> : vector<28x224xf32>
    %50 = tpu.matmul %47, %49, %cst_75 {dimension_numbers = #tpu.dot_dimension_numbers<[1], [0], [0], [1], [0, 0, 1, 1], [], []>} : vector<28x28xf32>, vector<28x224xf32>, vector<28x224xf32> -> vector<28x224xf32>
    %51 = arith.addf %45, %50 : vector<28x224xf32>
    %c0_76 = arith.constant 0 : index
    %c2_77 = arith.constant 2 : index
    %c0_78 = arith.constant 0 : index
    %c0_79 = arith.constant 0 : index
    %52 = vector.load %arg1[%c0_76, %c2_77, %c0_78, %c0_79] : memref<1x3x28x28xf32, #tpu.memory_space<vmem>>, vector<1x1x28x28xf32>
    %53 = vector.shape_cast %52 : vector<1x1x28x28xf32> to vector<28x28xf32>
    %c2_80 = arith.constant 2 : index
    %c2_81 = arith.constant 2 : index
    %c0_82 = arith.constant 0 : index
    %c0_83 = arith.constant 0 : index
    %54 = vector.load %arg2[%c2_80, %c2_81, %c0_82, %c0_83] : memref<3x3x28x224xf32, #tpu.memory_space<vmem>>, vector<1x1x28x224xf32>
    %55 = vector.shape_cast %54 : vector<1x1x28x224xf32> to vector<28x224xf32>
    %cst_84 = arith.constant dense<0.000000e+00> : vector<28x224xf32>
    %56 = tpu.matmul %53, %55, %cst_84 {dimension_numbers = #tpu.dot_dimension_numbers<[1], [0], [0], [1], [0, 0, 1, 1], [], []>} : vector<28x28xf32>, vector<28x224xf32>, vector<28x224xf32> -> vector<28x224xf32>
    %57 = arith.addf %51, %56 : vector<28x224xf32>
    %c2_85 = arith.constant 2 : index
    %c0_86 = arith.constant 0 : index
    %c0_87 = arith.constant 0 : index
    %58 = vector.load %arg3[%c2_85, %c0_86, %c0_87] : memref<3x14x28xf32, #tpu.memory_space<vmem>>, vector<1x14x28xf32>
    %59 = vector.shape_cast %58 : vector<1x14x28xf32> to vector<14x28xf32>
    %cst_88 = arith.constant dense<0.000000e+00> : vector<14x224xf32>
    %60 = tpu.matmul %59, %57, %cst_88 {dimension_numbers = #tpu.dot_dimension_numbers<[1], [0], [0], [1], [0, 0, 1, 1], [], []>} : vector<14x28xf32>, vector<28x224xf32>, vector<14x224xf32> -> vector<14x224xf32>
    %61 = arith.addf %40, %60 : vector<14x224xf32>
    %c0_89 = arith.constant 0 : index
    %c0_90 = arith.constant 0 : index
    %62 = vector.load %arg4[%c0_89, %c0_90] : memref<1x224xf32, #tpu.memory_space<vmem>>, vector<1x224xf32>
    %63 = vector.broadcast %62 : vector<1x224xf32> to vector<14x224xf32>
    %64 = arith.addf %61, %63 : vector<14x224xf32>
    %cst_91 = arith.constant 0.000000e+00 : f32
    %65 = vector.broadcast %cst_91 : f32 to vector<14x224xf32>
    %66 = arith.maximumf %64, %65 : vector<14x224xf32>
    %c0_92 = arith.constant 0 : index
    %c0_93 = arith.constant 0 : index
    %c0_94 = arith.constant 0 : index
    %67 = vector.load %arg5[%c0_92, %c0_93, %c0_94] : memref<3x224x224xf32, #tpu.memory_space<vmem>>, vector<1x224x224xf32>
    %68 = vector.shape_cast %67 : vector<1x224x224xf32> to vector<224x224xf32>
    %cst_95 = arith.constant dense<0.000000e+00> : vector<14x224xf32>
    %69 = tpu.matmul %66, %68, %cst_95 {dimension_numbers = #tpu.dot_dimension_numbers<[1], [0], [0], [1], [0, 0, 1, 1], [], []>} : vector<14x224xf32>, vector<224x224xf32>, vector<14x224xf32> -> vector<14x224xf32>
    %c0_96 = arith.constant 0 : index
    %c0_97 = arith.constant 0 : index
    %c0_98 = arith.constant 0 : index
    %70 = vector.load %arg6[%c0_96, %c0_97, %c0_98] : memref<3x7x14xf32, #tpu.memory_space<vmem>>, vector<1x7x14xf32>
    %71 = vector.shape_cast %70 : vector<1x7x14xf32> to vector<7x14xf32>
    %cst_99 = arith.constant dense<0.000000e+00> : vector<7x224xf32>
    %72 = tpu.matmul %71, %69, %cst_99 {dimension_numbers = #tpu.dot_dimension_numbers<[1], [0], [0], [1], [0, 0, 1, 1], [], []>} : vector<7x14xf32>, vector<14x224xf32>, vector<7x224xf32> -> vector<7x224xf32>
    %c1_100 = arith.constant 1 : index
    %c0_101 = arith.constant 0 : index
    %c0_102 = arith.constant 0 : index
    %73 = vector.load %arg5[%c1_100, %c0_101, %c0_102] : memref<3x224x224xf32, #tpu.memory_space<vmem>>, vector<1x224x224xf32>
    %74 = vector.shape_cast %73 : vector<1x224x224xf32> to vector<224x224xf32>
    %cst_103 = arith.constant dense<0.000000e+00> : vector<14x224xf32>
    %75 = tpu.matmul %66, %74, %cst_103 {dimension_numbers = #tpu.dot_dimension_numbers<[1], [0], [0], [1], [0, 0, 1, 1], [], []>} : vector<14x224xf32>, vector<224x224xf32>, vector<14x224xf32> -> vector<14x224xf32>
    %c1_104 = arith.constant 1 : index
    %c0_105 = arith.constant 0 : index
    %c0_106 = arith.constant 0 : index
    %76 = vector.load %arg6[%c1_104, %c0_105, %c0_106] : memref<3x7x14xf32, #tpu.memory_space<vmem>>, vector<1x7x14xf32>
    %77 = vector.shape_cast %76 : vector<1x7x14xf32> to vector<7x14xf32>
    %cst_107 = arith.constant dense<0.000000e+00> : vector<7x224xf32>
    %78 = tpu.matmul %77, %75, %cst_107 {dimension_numbers = #tpu.dot_dimension_numbers<[1], [0], [0], [1], [0, 0, 1, 1], [], []>} : vector<7x14xf32>, vector<14x224xf32>, vector<7x224xf32> -> vector<7x224xf32>
    %79 = arith.addf %72, %78 : vector<7x224xf32>
    %c2_108 = arith.constant 2 : index
    %c0_109 = arith.constant 0 : index
    %c0_110 = arith.constant 0 : index
    %80 = vector.load %arg5[%c2_108, %c0_109, %c0_110] : memref<3x224x224xf32, #tpu.memory_space<vmem>>, vector<1x224x224xf32>
    %81 = vector.shape_cast %80 : vector<1x224x224xf32> to vector<224x224xf32>
    %cst_111 = arith.constant dense<0.000000e+00> : vector<14x224xf32>
    %82 = tpu.matmul %66, %81, %cst_111 {dimension_numbers = #tpu.dot_dimension_numbers<[1], [0], [0], [1], [0, 0, 1, 1], [], []>} : vector<14x224xf32>, vector<224x224xf32>, vector<14x224xf32> -> vector<14x224xf32>
    %c2_112 = arith.constant 2 : index
    %c0_113 = arith.constant 0 : index
    %c0_114 = arith.constant 0 : index
    %83 = vector.load %arg6[%c2_112, %c0_113, %c0_114] : memref<3x7x14xf32, #tpu.memory_space<vmem>>, vector<1x7x14xf32>
    %84 = vector.shape_cast %83 : vector<1x7x14xf32> to vector<7x14xf32>
    %cst_115 = arith.constant dense<0.000000e+00> : vector<7x224xf32>
    %85 = tpu.matmul %84, %82, %cst_115 {dimension_numbers = #tpu.dot_dimension_numbers<[1], [0], [0], [1], [0, 0, 1, 1], [], []>} : vector<7x14xf32>, vector<14x224xf32>, vector<7x224xf32> -> vector<7x224xf32>
    %86 = arith.addf %79, %85 : vector<7x224xf32>
    %c0_116 = arith.constant 0 : index
    %c0_117 = arith.constant 0 : index
    %87 = vector.load %arg7[%c0_116, %c0_117] : memref<1x224xf32, #tpu.memory_space<vmem>>, vector<1x224xf32>
    %88 = vector.broadcast %87 : vector<1x224xf32> to vector<7x224xf32>
    %89 = arith.addf %86, %88 : vector<7x224xf32>
    %cst_118 = arith.constant 0.000000e+00 : f32
    %90 = vector.broadcast %cst_118 : f32 to vector<7x224xf32>
    %91 = arith.maximumf %89, %90 : vector<7x224xf32>
    %c0_119 = arith.constant 0 : index
    %c0_120 = arith.constant 0 : index
    %92 = vector.load %arg8[%c0_119, %c0_120] : memref<224x10xf32, #tpu.memory_space<vmem>>, vector<224x10xf32>
    %cst_121 = arith.constant dense<0.000000e+00> : vector<7x10xf32>
    %93 = tpu.matmul %91, %92, %cst_121 {dimension_numbers = #tpu.dot_dimension_numbers<[1], [0], [0], [1], [0, 0, 1, 1], [], []>} : vector<7x224xf32>, vector<224x10xf32>, vector<7x10xf32> -> vector<7x10xf32>
    %cst_122 = arith.constant dense<0.000000e+00> : vector<10xf32>
    %94 = vector.multi_reduction <add>, %93, %cst_122 [0] : vector<7x10xf32> to vector<10xf32>
    %95 = vector.shape_cast %94 : vector<10xf32> to vector<1x10xf32>
    %c0_123 = arith.constant 0 : index
    %c0_124 = arith.constant 0 : index
    %96 = vector.load %arg9[%c0_123, %c0_124] : memref<1x10xf32, #tpu.memory_space<vmem>>, vector<1x10xf32>
    %97 = arith.addf %95, %96 : vector<1x10xf32>
    %98 = arith.negf %97 : vector<1x10xf32>
    %99 = math.exp %98 : vector<1x10xf32>
    %cst_125 = arith.constant 1.000000e+00 : f32
    %100 = vector.broadcast %cst_125 : f32 to vector<1x10xf32>
    %101 = arith.addf %100, %99 : vector<1x10xf32>
    %102 = arith.divf %100, %101 : vector<1x10xf32>
    %103 = vector.shape_cast %102 : vector<1x10xf32> to vector<1x1x10xf32>
    %c0_126 = arith.constant 0 : index
    %c0_127 = arith.constant 0 : index
    %c0_128 = arith.constant 0 : index
    %104 = vector.load %arg10[%c0_126, %c0_127, %c0_128] : memref<1x1x10xf32, #tpu.memory_space<vmem>>, vector<1x1x10xf32>
    tpu.vector_store %arg10[%c0_126, %c0_127, %c0_128], %103 {strides = array<i32>} : memref<1x1x10xf32, #tpu.memory_space<vmem>>, vector<1x1x10xf32>,
    return
  }
  func.func @transform_0(%arg0: i32) -> (i32, i32, i32, i32) {
    %c0_i32 = arith.constant 0 : i32
    %c0_i32_0 = arith.constant 0 : i32
    %c0_i32_1 = arith.constant 0 : i32
    %c0_i32_2 = arith.constant 0 : i32
    return %arg0, %c0_i32, %c0_i32_0, %c0_i32_1 : i32, i32, i32, i32
  }
  func.func @transform_1(%arg0: i32) -> (i32, i32, i32, i32) {
    %c0_i32 = arith.constant 0 : i32
    %c0_i32_0 = arith.constant 0 : i32
    %c0_i32_1 = arith.constant 0 : i32
    %c0_i32_2 = arith.constant 0 : i32
    %c0_i32_3 = arith.constant 0 : i32
    return %c0_i32, %c0_i32_0, %c0_i32_1, %c0_i32_2 : i32, i32, i32, i32
  }
  func.func @transform_2(%arg0: i32) -> (i32, i32, i32) {
    %c0_i32 = arith.constant 0 : i32
    %c0_i32_0 = arith.constant 0 : i32
    %c0_i32_1 = arith.constant 0 : i32
    %c0_i32_2 = arith.constant 0 : i32
    return %c0_i32, %c0_i32_0, %c0_i32_1 : i32, i32, i32
  }
  func.func @transform_3(%arg0: i32) -> (i32, i32) {
    %c0_i32 = arith.constant 0 : i32
    %c0_i32_0 = arith.constant 0 : i32
    %c0_i32_1 = arith.constant 0 : i32
    return %c0_i32, %c0_i32_0 : i32, i32
  }
  func.func @transform_4(%arg0: i32) -> (i32, i32, i32) {
    %c0_i32 = arith.constant 0 : i32
    %c0_i32_0 = arith.constant 0 : i32
    %c0_i32_1 = arith.constant 0 : i32
    %c0_i32_2 = arith.constant 0 : i32
    return %c0_i32, %c0_i32_0, %c0_i32_1 : i32, i32, i32
  }
  func.func @transform_5(%arg0: i32) -> (i32, i32, i32) {
    %c0_i32 = arith.constant 0 : i32
    %c0_i32_0 = arith.constant 0 : i32
    %c0_i32_1 = arith.constant 0 : i32
    %c0_i32_2 = arith.constant 0 : i32
    return %c0_i32, %c0_i32_0, %c0_i32_1 : i32, i32, i32
  }
  func.func @transform_6(%arg0: i32) -> (i32, i32) {
    %c0_i32 = arith.constant 0 : i32
    %c0_i32_0 = arith.constant 0 : i32
    %c0_i32_1 = arith.constant 0 : i32
    return %c0_i32, %c0_i32_0 : i32, i32
  }
  func.func @transform_7(%arg0: i32) -> (i32, i32) {
    %c0_i32 = arith.constant 0 : i32
    %c0_i32_0 = arith.constant 0 : i32
    %c0_i32_1 = arith.constant 0 : i32
    return %c0_i32, %c0_i32_0 : i32, i32
  }
  func.func @transform_8(%arg0: i32) -> (i32, i32) {
    %c0_i32 = arith.constant 0 : i32
    %c0_i32_0 = arith.constant 0 : i32
    %c0_i32_1 = arith.constant 0 : i32
    return %c0_i32, %c0_i32_0 : i32, i32
  }
  func.func @transform_9(%arg0: i32) -> (i32, i32, i32) {
    %c0_i32 = arith.constant 0 : i32
    %c0_i32_0 = arith.constant 0 : i32
    %c0_i32_1 = arith.constant 0 : i32
    return %arg0, %c0_i32, %c0_i32_0 : i32, i32, i32
  }
}

</mosaic_0001>

<bundles_post_ra>
// kernel: convnet_forward.1
= control target key start
LH: loop header
LB: loop body
LE: loop exit
PB: predicated region body
PF: predicated region fallthrough
CT: control target
= control target key end

     0   :  { %14 = vsyncpa [#allocation3], 0  ;;  %s3783_s0 = inlined_call_operand.vmem [shape: f32[2,3,28,28], index: 0, kind: input, shape index: {}]   ;;  %s3784_s1 = inlined_call_operand.vmem [shape: f32[3,3,28,224], index: 1, kind: input, shape index: {}]   ;;  %s3785_s2 = inlined_call_operand.hbm [shape: f32[3,14,28], index: 2, kind: input, shape index: {}]   ;;  %s3786_s3 = inlined_call_operand.vmem [shape: f32[1,224], index: 3, kind: input, shape index: {}]   ;;  %s3787_s4 = inlined_call_operand.hbm [shape: f32[3,224,224], index: 4, kind: input, shape index: {}]   ;;  %s3788_s5 = inlined_call_operand.hbm [shape: f32[3,7,14], index: 5, kind: input, shape index: {}]   ;;  %s3789_s6 = inlined_call_operand.vmem [shape: f32[1,224], index: 6, kind: input, shape index: {}]   ;;  %s3790_s7 = inlined_call_operand.vmem [shape: f32[224,10], index: 7, kind: input, shape index: {}]   ;;  %s3791_s8 = inlined_call_operand.vmem [shape: f32[1,10], index: 8, kind: input, shape index: {}]   ;;  %s3792_s9 = inlined_call_operand.hbm [shape: f32[2,1,10], index: 9, kind: output, shape index: {}]  }
   0x1   :  { %15 = vsyncpa [#allocation6], 0 }
   0x2   :  { %16 = vsyncpa [#allocation4], 0 }
   0x3   :  { %18 = vsyncpa [#allocation4 + $0x1], 0  ;;  %s3031_s30 = smov 0   ;;  %s3033_s10 = smov 0  }
   0x4   :  { %s3035_s11 = smov 0   ;;  %s3037_s12 = smov 0  }
   0x5 LB: > { %s3052_s13 = sadd.s32 4294967295, %s2970_s12   ;;  %s2575_s14 = sadd.s32 4294967294, %s2970_s12   ;;  %s2970_s12 = sphi %s3037_s12, %s3808_s12   ;;  %s2966_s11 = sphi %s3035_s11, %s3807_s11   ;;  %s2962_s10 = sphi %s3033_s10, %s3806_s10   ;;  %s2958_s30 = sphi %s3031_s30, %s3805_s30  }
   0x6   : > { %s3056_s15 = sadd.s32 1, %s2970_s12   ;;  %s225_s16 = sadd.s32 1, %s2966_s11 }
   0x7   : > { %s222_s17 = ssub.s32 %s2970_s12, %s3056_s15  ;;  %p235_p0 = scmp.ne.s32.totalorder %s2966_s11, %s2962_s10 }
   0x8   : > { %p223_p1 = scmp.eq.s32.totalorder %s222_s17, 0  ;;  %p236_p2 = scmp.eq.s32.totalorder %s3052_s13, 1 }
   0x9   : > { %p241_p3 = scmp.ne.s32.totalorder %s2962_s10, %s2958_s30  ;;  %p242_p4 = scmp.eq.s32.totalorder %s2575_s14, 1 }
   0xa   : > { %s3067_s18 = scalar_select %p223_p1, %s2966_s11, %s225_s16  }
   0xb   : > { %p3069_p5 = por %p236_p2, %p235_p0  ;;  %p3073_p6 = por %p242_p4, %p241_p3 }
   0xc   : > { %3794 = sst [smem:[#allocation12_spill]] %s3067_s18  ;;  %p2576_p7 = scmp.ge.s32.totalorder %s2970_s12, 1 }
   0xd   : > { %s3796_s20 = scalar_select %p3073_p6, 1, 0 }
   0xe   : > { %p249_p8 = scmp.lt.s32.totalorder %s2970_s12, 3  ;;  %p3793_p9 = scmp.eq.s32.totalorder %s3052_s13, 0 }
   0xf   : > { %s2972_s22 = smov [#allocation5]   ;;  %s2973_s25 = smov [#allocation2]  }
  0x10   : > { %p3080_p10 = pnand %p2576_p7, %p249_p8  ;;  %s280_s23 = sshll.u32 %s2972_s22, 4  ;;  %s281_s23 = int_to_ptr.vmem [resolvable:$true] %s280_s23 }
  0x11   : > { %s264_s26 = sshll.u32 %s2973_s25, 4  ;;  %s2835_s27 = scalar_lea.vmem %s281_s23, 21504  ;;  %s265_s26 = int_to_ptr.vmem [resolvable:$true] %s264_s26 }
  0x12   : > { %p2759_p11 = pneg %p3080_p10  ;;  %p2836_p0 = scmp.ne.s32.totalorder %s281_s23, %s2835_s27 }
  0x13   : > { %p2843_p3 = scmp.lt.s32.totalorder %s281_s23, %s281_s23  ;;  %p2844_p4 = scmp.lt.s32.totalorder %s2835_s27, %s2835_s27 }
  0x14   : > { %p3088_p12 = pnand %p3793_p9, %p2759_p11 }
  0x15   : > { %p2845_p7 = por %p2844_p4, %p2843_p3 }
  0x16   : > { %p2826_p13 = pneg %p3088_p12 }
  0x18   : > { %p2838_p1 = pnand %p2836_p0, %p2826_p13 }
  0x1a   : > { %p2839_p2 = pneg %p2838_p1 }
  0x1c   : > { %p2846_p8 = pnand %p2845_p7, %p2839_p2 }
  0x1e   : > { %2849 = shalt.err (!%p2846_p8)
}
  0x1f   : > { %s2974_s28 = smov 256   ;;  %s2975_s29 = smov 16  }
  0x20   : > { %2765 = dma.hbm_to_vmem [thread:$0]  (!%p3088_p12), %s3787_s4, 21504, %s281_s23, [#allocation6], %s2974_s28, %s2974_s28, %s2975_s29  }
  0x21   : > { %s2861_s17 = scalar_lea.vmem %s265_s26, 768  ;;  %p2869_p9 = scmp.lt.s32.totalorder %s265_s26, %s265_s26 }
  0x22   : > { %p2862_p11 = scmp.ne.s32.totalorder %s265_s26, %s2861_s17  ;;  %p2870_p6 = scmp.lt.s32.totalorder %s2861_s17, %s2861_s17 }
  0x24   : > { %p2864_p0 = pnand %p2862_p11, %p2826_p13  ;;  %p2871_p3 = por %p2870_p6, %p2869_p9 }
  0x26   : > { %p2865_p1 = pneg %p2864_p0 }
  0x28   : > { %p2872_p2 = pnand %p2871_p3, %p2865_p1 }
  0x2a   : > { %2875 = shalt.err (!%p2872_p2)
}
  0x2b   : > { %s2976_s22 = smov 128   ;;  %s2977_s25 = smov 8  }
  0x2c   : > { %2762 = dma.hbm_to_vmem [thread:$0]  (!%p3088_p12), %s3785_s2, 768, %s265_s26, [#allocation3], %s2976_s22, %s2976_s22, %s2977_s25  }
  0x2d   : > { %s2978_s23 = smov [#allocation7]  }
  0x2e   : > { %s293_s28 = sshll.u32 %s2978_s23, 4  ;;  %s294_s28 = int_to_ptr.vmem [resolvable:$true] %s293_s28 }
  0x2f   : > { %s2887_s29 = scalar_lea.vmem %s294_s28, 384  ;;  %p2895_p9 = scmp.lt.s32.totalorder %s294_s28, %s294_s28 }
  0x30   : > { %p2888_p4 = scmp.ne.s32.totalorder %s294_s28, %s2887_s29  ;;  %p2896_p8 = scmp.lt.s32.totalorder %s2887_s29, %s2887_s29 }
  0x32   : > { %p2890_p7 = pnand %p2888_p4, %p2826_p13  ;;  %p2897_p11 = por %p2896_p8, %p2895_p9 }
  0x34   : > { %p2891_p6 = pneg %p2890_p7 }
  0x36   : > { %p2898_p0 = pnand %p2897_p11, %p2891_p6 }
  0x38   : > { %2901 = shalt.err (!%p2898_p0)
}
  0x39   : > { %2768 = dma.hbm_to_vmem [thread:$0]  (!%p3088_p12), %s3788_s5, 384, %s294_s28, [#allocation6], %s2976_s22, %s2976_s22, %s2977_s25  }
  0x3a   : > { %326 = sbr.rel (%p3080_p10) target bundleno = 1688 (0x698), region = 56  ;;  %p3799_p1 = scmp.eq.s32.totalorder (!%p3080_p10), %s3052_s13, 0 }
  0x3f   : > { %2945 = dma.done.wait (%p3799_p1), [#allocation3], 768   ;;  %p3800_p13 = pmov %p3799_p1 }
  0x40   : > { %p3801_p3 = pmov %p3799_p1 }
  0x41   : > { %2947 = vsyncadd (%p3800_p13), [#allocation3], 4294966528 }
  0x42   : > { %2949 = dma.done.wait (%p3801_p3), [#allocation6], 21888   ;;  %p3802_p2 = pmov %p3799_p1 }
  0x43   : > { %p369_p4 = scmp.lt.s32.totalorder %s3052_s13, 1  ;;  %v2979_v0 = vmov 0.0   ;;  %vm413_vm0 = vcmask 1043456   ;;  %v2597_v1 = vld [vmem:[%s3784_s1 + $0xf8] sm:$0xf]  ;;  %v2595_v5 = vld [vmem:[%s3784_s1 + $0xe8] sm:$0xff] }
  0x44   : > { %2951 = vsyncadd (%p3802_p2), [#allocation6], 4294945408  ;;  %484 = vmatprep.mubr.f32.mxu0 %v2979_v0  ;;  %591 = vmatprep.mubr.f32.mxu1 %v2979_v0  ;;  %v385_v2 = vld [vmem:[%s3784_s1 + $0x38] sm:$0xf]  ;;  %v2596_v3 = vld [vmem:[%s3784_s1 + $0xf0] sm:$0xf] }
  0x45   : > { %s370_s18 = scalar_select %p369_p4, %s3052_s13, 1  ;;  %2598 = vmatprep.subr.msk.mxu0 %vm413_vm0, %v2597_v1  ;;  %2604 = vmatprep.subr.msk.mxu1 %vm413_vm0, %v385_v2  ;;  %v384_v4 = vld [vmem:[%s3784_s1 + $0x30] sm:$0xf]  ;;  %v383_v6 = vld [vmem:[%s3784_s1 + $0x28] sm:$0xff]  ;;  %v2594_v7 = vld [vmem:[%s3784_s1 + $0xe0] sm:$0xff]  ;;  %vm400_vm1 = vcmask 228352  }
  0x46   : > { %2599 = vmatpush1.msk.msra.mxu0 %vm413_vm0, %v2596_v3  ;;  %2605 = vmatpush1.msk.msra.mxu1 %vm413_vm0, %v384_v4  ;;  %v382_v8 = vld [vmem:[%s3784_s1 + $0x20] sm:$0xff]  ;;  %v2593_v9 = vld [vmem:[%s3784_s1 + $0xd8] sm:$0xff]  ;;  %v2592_v11 = vld [vmem:[%s3784_s1 + $0xd0] sm:$0xff]  ;;  %vm1740_vm2 = vcmask 785408   ;;  %vm1965_vm3 = vcmask 1045504   ;;  %vm1961_vm4 = vcmask 113664  }
  0x47   : > { %s2744_s21 = smul.u32 96, %s370_s18  ;;  %446 = vmatprep.subr.mxu0 %v2595_v5  ;;  %553 = vmatprep.subr.mxu1 %v383_v6  ;;  %v381_v10 = vld [vmem:[%s3784_s1 + $0x18] sm:$0xff]  ;;  %v380_v12 = vld [vmem:[%s3784_s1 + $0x10] sm:$0xff]  ;;  %v2591_v13 = vld [vmem:[%s3784_s1 + $0xc8] sm:$0xff]  ;;  %vm2458_vm5 = vcmask 79872   ;;  %s367_s29 = sand.u32 1, %s2962_s10  }
  0x48   : > { %447 = vmatpush1.msra.mxu0 %v2594_v7  ;;  %554 = vmatpush1.msra.mxu1 %v382_v8  ;;  %v379_v14 = vld [vmem:[%s3784_s1 + $0x8] sm:$0xff]  ;;  %v2590_v15 = vld [vmem:[%s3784_s1 + $0xc0] sm:$0xff]  ;;  %v2621_v19 = vld [vmem:[%s3784_s1 + $0x1b8] sm:$0xf]  ;;  %s368_s14 = scalar_lea.vmem [#allocation8], %s367_s29  ;;  %vm2474_vm6 = vcmask 73728  }
  0x49   : > { %s3175_s17 = scalar_lea.vmem %s3783_s0, %s2744_s21  ;;  %448 = vmatprep.subr.mxu0 %v2593_v9  ;;  %555 = vmatprep.subr.mxu1 %v381_v10  ;;  %v378_v16 = vld [vmem:[%s3784_s1] sm:$0xff]  ;;  %v2643_v20 = vld [vmem:[%s3784_s1 + $0x138] sm:$0xf]  ;;  %v2620_v21 = vld [vmem:[%s3784_s1 + $0x1b0] sm:$0xf]  ;;  %s2741_s21 = sshll.u32 %s3052_s13, 4 }
  0x4a   : > { %449 = vmatpush1.msra.mxu0 %v2592_v11  ;;  %556 = vmatpush1.msra.mxu1 %v380_v12  ;;  %v3190_v17 = vld [vmem:[%s3175_s17 + $0x20] sm:$0xff]  ;;  %v2642_v22 = vld [vmem:[%s3784_s1 + $0x130] sm:$0xf]  ;;  %v3214_v23 = vld [vmem:[%s3175_s17 + $0x28] sm:$0xff]  ;;  %s2489_s16 = sshll.u32 %s368_s14, 4  ;;  %s3748_s24 = scalar_lea.hbm %s3792_s9, %s2741_s21  ;;  %s2490_s16 = int_to_ptr.vmem [resolvable:$true] %s2489_s16 }
  0x4b   : > { %v3193_v18 = vld [vmem:[%s3175_s17] sm:$0xff]  ;;  %450 = vmatprep.subr.mxu0 %v2591_v13  ;;  %557 = vmatprep.subr.mxu1 %v379_v14  ;;  %v3217_v24 = vld [vmem:[%s3175_s17 + $0x8] sm:$0xff]  ;;  %v3242_v29 = vld [vmem:[%s3175_s17 + $0x30] sm:$0xff]  ;;  %s2477_s26 = scalar_lea.sflag [#allocation4], %s367_s29  ;;  %s2902_s22 = scalar_lea.vmem %s2490_s16, 16 }
  0x4c   : > { %451 = vmatpush1.msra.mxu0 %v2590_v15  ;;  %558 = vmatpush1.msra.mxu1 %v378_v16  ;;  %v2619_v25 = vld [vmem:[%s3784_s1 + $0x1a8] sm:$0xff]  ;;  %v2618_v27 = vld [vmem:[%s3784_s1 + $0x1a0] sm:$0xff]  ;;  %v3245_v30 = vld [vmem:[%s3175_s17 + $0x10] sm:$0xff]  ;;  %p2903_p10 = scmp.ne.s32.totalorder %s2490_s16, %s2902_s22  ;;  %s2980_s25 = smov [#allocation8]  }
  0x4d   : > { %2600 = vmatmul.mubr.msk.f32.vlgmr.msra.gmra.mxu0 %vm400_vm1, %v3190_v17  ;;  %2606 = vmatmul.mubr.msk.f32.vlgmr.msra.gmra.mxu1 %vm400_vm1, %v3193_v18  ;;  %v2641_v26 = vld [vmem:[%s3784_s1 + $0x128] sm:$0xff]  ;;  %v2640_v28 = vld [vmem:[%s3784_s1 + $0x120] sm:$0xff]  ;;  %v2617_v31 = vld [vmem:[%s3784_s1 + $0x198] sm:$0xff]  ;;  %s2906_s27 = sshll.u32 %s2980_s25, 4  ;;  %s2907_s27 = int_to_ptr.vmem [resolvable:$false] %s2906_s27 }
  0x4e   : > { %490 = vmatprep.mubr.f32.mxu0 %v2979_v0  ;;  %597 = vmatprep.mubr.f32.mxu1 %v2979_v0  ;;  %v2639_v32 = vld [vmem:[%s3784_s1 + $0x118] sm:$0xff]  ;;  %v2616_v33 = vld [vmem:[%s3784_s1 + $0x190] sm:$0xff]  ;;  %v2615_v37 = vld [vmem:[%s3784_s1 + $0x188] sm:$0xff]  ;;  %p2904_p12 = pnand %p2903_p10, %p3069_p5  ;;  %s2908_s13 = scalar_lea.vmem %s2907_s27, 32 }
  0x4f   : > { %2622 = vmatprep.subr.msk.mxu0 %vm413_vm0, %v2621_v19  ;;  %2644 = vmatprep.subr.msk.mxu1 %vm413_vm0, %v2643_v20  ;;  %v2638_v34 = vld [vmem:[%s3784_s1 + $0x110] sm:$0xff]  ;;  %v3266_v35 = vld [vmem:[%s3175_s17 + $0x38] sm:$0xf]  ;;  %v2637_v38 = vld [vmem:[%s3784_s1 + $0x108] sm:$0xff]  ;;  %p2909_p6 = scmp.lt.s32.totalorder %s2490_s16, %s2907_s27  ;;  %p2910_p9 = scmp.lt.s32.totalorder %s2908_s13, %s2902_s22 }
  0x50   : > { %2623 = vmatpush1.msk.msra.mxu0 %vm413_vm0, %v2620_v21  ;;  %2645 = vmatpush1.msk.msra.mxu1 %vm413_vm0, %v2642_v22  ;;  %v3269_v36 = vld [vmem:[%s3175_s17 + $0x18] sm:$0xf]  ;;  %v2614_v39 = vld [vmem:[%s3784_s1 + $0x180] sm:$0xff]  ;;  %v2634_v44 = vld [vmem:[%s3784_s1 + $0x70] sm:$0xf]  ;;  %p2905_p7 = pneg %p2904_p12 }
  0x51   : > { %2601 = vmatmul.mubr.msk.f32.gmra.mxu0 %vm400_vm1, %v3214_v23  ;;  %2607 = vmatmul.mubr.msk.f32.gmra.mxu1 %vm400_vm1, %v3217_v24  ;;  %v2636_v40 = vld [vmem:[%s3784_s1 + $0x100] sm:$0xff]  ;;  %v2635_v42 = vld [vmem:[%s3784_s1 + $0x78] sm:$0xf]  ;;  %v2662_v45 = vld [vmem:[%s3784_s1 + $0x1f0] sm:$0xf]  ;;  %p2911_p8 = por %p2910_p9, %p2909_p6 }
  0x52   : > { %496 = vmatprep.mubr.f32.mxu0 %v2979_v0  ;;  %603 = vmatprep.mubr.f32.mxu1 %v2979_v0  ;;  %v3288_v41 = vld [vmem:[%s3175_s17 + $0x40] sm:$0xff]  ;;  %v2663_v43 = vld [vmem:[%s3784_s1 + $0x1f8] sm:$0xf]  ;;  %v3311_v46 = vld [vmem:[%s3175_s17 + $0x48] sm:$0xff] }
  0x53   : > { %674 = vmatprep.subr.mxu0 %v2619_v25  ;;  %797 = vmatprep.subr.mxu1 %v2641_v26  ;;  %v2633_v47 = vld [vmem:[%s3784_s1 + $0x68] sm:$0xff]  ;;  %v2632_v49 = vld [vmem:[%s3784_s1 + $0x60] sm:$0xff]  ;;  %v3336_v51 = vld [vmem:[%s3175_s17 + $0x50] sm:$0xff]  ;;  %p2912_p11 = pnand %p2911_p8, %p2905_p7 }
  0x54   : > { %675 = vmatpush1.msra.mxu0 %v2618_v27  ;;  %798 = vmatpush1.msra.mxu1 %v2640_v28  ;;  %v2661_v48 = vld [vmem:[%s3784_s1 + $0x1e8] sm:$0xff]  ;;  %v2660_v50 = vld [vmem:[%s3784_s1 + $0x1e0] sm:$0xff]  ;;  %v2631_v52 = vld [vmem:[%s3784_s1 + $0x58] sm:$0xff] }
  0x55   : > { %2602 = vmatmul.mubr.msk.f32.gmra.mxu0 %vm400_vm1, %v3242_v29  ;;  %2608 = vmatmul.mubr.msk.f32.gmra.mxu1 %vm400_vm1, %v3245_v30  ;;  %v2659_v53 = vld [vmem:[%s3784_s1 + $0x1d8] sm:$0xff]  ;;  %v2630_v54 = vld [vmem:[%s3784_s1 + $0x50] sm:$0xff]  ;;  %v2629_v57 = vld [vmem:[%s3784_s1 + $0x48] sm:$0xff] }
  0x56   : > { %502 = vmatprep.mubr.f32.mxu0 %v2979_v0  ;;  %609 = vmatprep.mubr.f32.mxu1 %v2979_v0  ;;  %v2658_v55 = vld [vmem:[%s3784_s1 + $0x1d0] sm:$0xff]  ;;  %v3357_v56 = vld [vmem:[%s3175_s17 + $0x58] sm:$0xf]  ;;  %v2657_v58 = vld [vmem:[%s3784_s1 + $0x1c8] sm:$0xff] }
  0x57   : > { %676 = vmatprep.subr.mxu0 %v2617_v31  ;;  %799 = vmatprep.subr.mxu1 %v2639_v32  ;;  %v2628_v59 = vld [vmem:[%s3784_s1 + $0x40] sm:$0xff] }
  0x58   : > { %677 = vmatpush1.msra.mxu0 %v2616_v33  ;;  %800 = vmatpush1.msra.mxu1 %v2638_v34  ;;  %v2656_v60 = vld [vmem:[%s3784_s1 + $0x1c0] sm:$0xff] }
  0x59   : > { %2603 = vmatmul.mubr.msk.f32.gmra.mxu0 %vm400_vm1, %v3266_v35  ;;  %2609 = vmatmul.mubr.msk.f32.gmra.mxu1 %vm400_vm1, %v3269_v36 }
  0x5a   : > { %678 = vmatprep.subr.mxu0 %v2615_v37  ;;  %801 = vmatprep.subr.mxu1 %v2637_v38 }
  0x5b   : > { %679 = vmatpush1.msra.mxu0 %v2614_v39  ;;  %712 = vmatprep.mubr.f32.mxu0 %v2979_v0 }
  0x5c   : > { %802 = vmatpush1.msra.mxu1 %v2636_v40  ;;  %835 = vmatprep.mubr.f32.mxu1 %v2979_v0 }
  0x5d   : > { %2624 = vmatmul.mubr.msk.f32.vlgmr.msra.gmra.mxu0 %vm400_vm1, %v3288_v41  ;;  %2646 = vmatmul.mubr.msk.f32.vlgmr.msra.gmra.mxu1 %vm400_vm1, %v3190_v17 }
  0x5e   : > { %718 = vmatprep.mubr.f32.mxu0 %v2979_v0  ;;  %841 = vmatprep.mubr.f32.mxu1 %v2979_v0 }
  0x5f   : > { %2650 = vmatprep.subr.msk.mxu0 %vm413_vm0, %v2635_v42  ;;  %2664 = vmatprep.subr.msk.mxu1 %vm413_vm0, %v2663_v43 }
  0x60   : > { %2651 = vmatpush1.msk.msra.mxu0 %vm413_vm0, %v2634_v44  ;;  %2665 = vmatpush1.msk.msra.mxu1 %vm413_vm0, %v2662_v45 }
  0x61   : > { %2625 = vmatmul.mubr.msk.f32.gmra.mxu0 %vm400_vm1, %v3311_v46  ;;  %2647 = vmatmul.mubr.msk.f32.gmra.mxu1 %vm400_vm1, %v3214_v23 }
  0x62   : > { %724 = vmatprep.mubr.f32.mxu0 %v2979_v0  ;;  %847 = vmatprep.mubr.f32.mxu1 %v2979_v0 }
  0x63   : > { %892 = vmatprep.subr.mxu0 %v2633_v47  ;;  %996 = vmatprep.subr.mxu1 %v2661_v48 }
  0x64   : > { %893 = vmatpush1.msra.mxu0 %v2632_v49  ;;  %997 = vmatpush1.msra.mxu1 %v2660_v50 }
  0x65   : > { %2626 = vmatmul.mubr.msk.f32.gmra.mxu0 %vm400_vm1, %v3336_v51  ;;  %2648 = vmatmul.mubr.msk.f32.gmra.mxu1 %vm400_vm1, %v3242_v29 }
  0x66   : > { %730 = vmatprep.mubr.f32.mxu0 %v2979_v0  ;;  %853 = vmatprep.mubr.f32.mxu1 %v2979_v0 }
  0x67   : > { %894 = vmatprep.subr.mxu0 %v2631_v52  ;;  %998 = vmatprep.subr.mxu1 %v2659_v53 }
  0x68   : > { %895 = vmatpush1.msra.mxu0 %v2630_v54  ;;  %999 = vmatpush1.msra.mxu1 %v2658_v55 }
  0x69   : > { %2627 = vmatmul.mubr.msk.f32.gmra.mxu0 %vm400_vm1, %v3357_v56  ;;  %2649 = vmatmul.mubr.msk.f32.gmra.mxu1 %vm400_vm1, %v3266_v35 }
  0x6a   : > { %896 = vmatprep.subr.mxu0 %v2629_v57  ;;  %1000 = vmatprep.subr.mxu1 %v2657_v58 }
  0x6b   : > { %897 = vmatpush1.msra.mxu0 %v2628_v59  ;;  %930 = vmatprep.mubr.f32.mxu0 %v2979_v0 }
  0x6c   : > { %1001 = vmatpush1.msra.mxu1 %v2656_v60  ;;  %1034 = vmatprep.mubr.f32.mxu1 %v2979_v0 }
  0x6d   : > { %2652 = vmatmul.mubr.msk.f32.vlgmr.msra.gmra.mxu0 %vm400_vm1, %v3193_v18  ;;  %2666 = vmatmul.mubr.msk.f32.vlgmr.msra.gmra.mxu1 %vm400_vm1, %v3288_v41 }
  0x6e   : > { %936 = vmatprep.mubr.f32.mxu0 %v2979_v0  ;;  %1040 = vmatprep.mubr.f32.mxu1 %v2979_v0 }
  0x71   : > { %2653 = vmatmul.mubr.msk.f32.gmra.mxu0 %vm400_vm1, %v3217_v24  ;;  %2667 = vmatmul.mubr.msk.f32.gmra.mxu1 %vm400_vm1, %v3311_v46 }
  0x72   : > { %942 = vmatprep.mubr.f32.mxu0 %v2979_v0  ;;  %1046 = vmatprep.mubr.f32.mxu1 %v2979_v0 }
  0x75   : > { %2654 = vmatmul.mubr.msk.f32.gmra.mxu0 %vm400_vm1, %v3245_v30  ;;  %2668 = vmatmul.mubr.msk.f32.gmra.mxu1 %vm400_vm1, %v3336_v51 }
  0x76   : > { %948 = vmatprep.mubr.f32.mxu0 %v2979_v0  ;;  %1052 = vmatprep.mubr.f32.mxu1 %v2979_v0 }
  0x79   : > { %2655 = vmatmul.mubr.msk.f32.gmra.mxu0 %vm400_vm1, %v3269_v36  ;;  %2669 = vmatmul.mubr.msk.f32.gmra.mxu1 %vm400_vm1, %v3357_v56 }
  0x7a   : > { %1146 = vmatprep.mubr.f32.mxu0 %v2979_v0  ;;  %1235 = vmatprep.mubr.f32.mxu1 %v2979_v0 }
 0x10d   : > { %v486_v61 = vpop.f32.mrf.mxu0  ;;  %v593_v62 = vpop.f32.mrf.mxu1 }
 0x10e   : > { %v594_v58 = vadd.f32 %v593_v62, %v486_v61  ;;  %v2684_v61 = vld [vmem:[%s3784_s1 + $0xb0] sm:$0xf] }
 0x10f   : > { %v488_v63 = vpop.f32.mrf.mxu0  ;;  %v595_v1 = vpop.f32.mrf.mxu1 }
 0x110   : > { %v596_v55 = vadd.f32 %v595_v1, %v488_v63  ;;  %v2683_v1 = vld [vmem:[%s3784_s1 + $0xa8] sm:$0xff] }
 0x111   : > { %v492_v2 = vpop.f32.mrf.mxu0  ;;  %v599_v3 = vpop.f32.mrf.mxu1 }
 0x112   : > { %v600_v50 = vadd.f32 %v599_v3, %v492_v2  ;;  %v745_v2 = vld [vmem:[#allocation2] sm:$0xff]  ;;  %v2685_v3 = vld [vmem:[%s3784_s1 + $0xb8] sm:$0xf] }
 0x113   : > { %v494_v4 = vpop.f32.mrf.mxu0  ;;  %v601_v5 = vpop.f32.mrf.mxu1 }
 0x114   : > { %v602_v48 = vadd.f32 %v601_v5, %v494_v4 }
 0x115   : > { %v498_v6 = vpop.f32.mrf.mxu0  ;;  %v605_v7 = vpop.f32.mrf.mxu1 }
 0x116   : > { %v606_v43 = vadd.f32 %v605_v7, %v498_v6 }
 0x117   : > { %v500_v8 = vpop.f32.mrf.mxu0  ;;  %v607_v9 = vpop.f32.mrf.mxu1 }
 0x118   : > { %v608_v40 = vadd.f32 %v607_v9, %v500_v8  ;;  %v2682_v9 = vld [vmem:[%s3784_s1 + $0xa0] sm:$0xff] }
 0x119   : > { %v504_v10 = vpop.f32.mrf.mxu0  ;;  %v611_v11 = vpop.f32.mrf.mxu1 }
 0x11a   : > { %v612_v37 = vadd.f32 %v611_v11, %v504_v10 }
 0x11b   : > { %v506_v12 = vpop.f32.mrf.mxu0  ;;  %v613_v13 = vpop.f32.mrf.mxu1 }
 0x11c   : > { %v614_v34 = vadd.f32 %v613_v13, %v506_v12  ;;  %v746_v12 = vld [vmem:[#allocation2 + $0x8] sm:$0x3f]  ;;  %v2681_v13 = vld [vmem:[%s3784_s1 + $0x98] sm:$0xff] }
 0x11d   : > { %v714_v14 = vpop.f32.mrf.mxu0  ;;  %v3401_v15 = vpop.f32.mrf.mxu1 }
 0x11e   : > { %v737_v4 = vadd.f32 %v714_v14, %v594_v58  ;;  %v2680_v14 = vld [vmem:[%s3784_s1 + $0x90] sm:$0xff]  ;;  %v2710_v58 = vld [vmem:[%s3784_s1 + $0x220] sm:$0xff] }
 0x11f   : > { %v716_v16 = vpop.f32.mrf.mxu0  ;;  %v3403_v19 = vpop.f32.mrf.mxu1 }
 0x120   : > { %v738_v7 = vadd.f32 %v716_v16, %v596_v55  ;;  %v2712_v55 = vld [vmem:[%s3784_s1 + $0x230] sm:$0xf] }
 0x121   : > { %v720_v20 = vpop.f32.mrf.mxu0  ;;  %v3405_v21 = vpop.f32.mrf.mxu1 }
 0x122   : > { %v739_v59 = vadd.f32 %v720_v20, %v600_v50  ;;  %v2689_v50 = vld [vmem:[%s3784_s1 + $0x158] sm:$0xff] }
 0x123   : > { %v722_v22 = vpop.f32.mrf.mxu0  ;;  %v3407_v25 = vpop.f32.mrf.mxu1 }
 0x124   : > { %v740_v57 = vadd.f32 %v722_v22, %v602_v48  ;;  %v2679_v22 = vld [vmem:[%s3784_s1 + $0x88] sm:$0xff] }
 0x125   : > { %v726_v26 = vpop.f32.mrf.mxu0  ;;  %v3409_v27 = vpop.f32.mrf.mxu1 }
 0x126   : > { %v741_v52 = vadd.f32 %v726_v26, %v606_v43  ;;  %v2678_v26 = vld [vmem:[%s3784_s1 + $0x80] sm:$0xff] }
 0x127   : > { %v728_v28 = vpop.f32.mrf.mxu0  ;;  %v3411_v31 = vpop.f32.mrf.mxu1 }
 0x128   : > { %v742_v49 = vadd.f32 %v728_v28, %v608_v40 }
 0x129   : > { %v732_v32 = vpop.f32.mrf.mxu0  ;;  %v855_v33 = vpop.f32.mrf.mxu1 }
 0x12a   : > { %v743_v44 = vadd.f32 %v732_v32, %v612_v37 }
 0x12b   : > { %v734_v38 = vpop.f32.mrf.mxu0  ;;  %v857_v39 = vpop.f32.mrf.mxu1 }
 0x12c   : > { %v744_v42 = vadd.f32 %v734_v38, %v614_v34 }
 0x12d   : > { %v3413_v45 = vpop.f32.mrf.mxu0  ;;  %v3415_v47 = vpop.f32.mrf.mxu1 }
 0x12e   : > { %2674 = vmatprep.subr.msk.mxu1 %vm413_vm0, %v744_v42 }
 0x12f   : > { %v934_v53 = vpop.f32.mrf.mxu0  ;;  %v3418_v54 = vpop.f32.mrf.mxu1  ;;  %2675 = vmatpush1.msk.msra.mxu1 %vm413_vm0, %v743_v44 }
 0x130   : > { %1197 = vmatprep.subr.mxu1 %v742_v49  ;;  %v935_v48 = vadd.f32 %v934_v53, %v3403_v19  ;;  %v1068_v49 = vld [vmem:[#allocation2 + $0x10] sm:$0xff]  ;;  %v2687_v53 = vld [vmem:[%s3784_s1 + $0x148] sm:$0xff] }
 0x131   : > { %v938_v60 = vpop.f32.mrf.mxu0  ;;  %v1042_v6 = vpop.f32.mrf.mxu1  ;;  %1198 = vmatpush1.msra.mxu1 %v741_v52  ;;  %v2688_v52 = vld [vmem:[%s3784_s1 + $0x150] sm:$0xff] }
 0x132   : > { %1199 = vmatprep.subr.mxu1 %v740_v57  ;;  %v1060_v19 = vadd.f32 %v3418_v54, %v935_v48  ;;  %v2686_v54 = vld [vmem:[%s3784_s1 + $0x140] sm:$0xff]  ;;  %v2711_v57 = vld [vmem:[%s3784_s1 + $0x228] sm:$0xff] }
 0x133   : > { %v940_v5 = vpop.f32.mrf.mxu0  ;;  %v1044_v8 = vpop.f32.mrf.mxu1  ;;  %1200 = vmatpush1.msra.mxu1 %v739_v59  ;;  %v2709_v59 = vld [vmem:[%s3784_s1 + $0x218] sm:$0xff]  ;;  %v1734_v48 = vld [vmem:[#allocation5 + $0x190] sm:$0xff] }
 0x134   : > { %1201 = vmatprep.subr.mxu1 %v738_v7  ;;  %v941_v42 = vadd.f32 %v940_v5, %v3407_v25  ;;  %v1711_v7 = vld [vmem:[#allocation5 + $0xd8] sm:$0xff]  ;;  %v1708_v5 = vld [vmem:[#allocation5 + $0xc0] sm:$0xff] }
 0x135   : > { %v944_v62 = vpop.f32.mrf.mxu0  ;;  %v1048_v63 = vpop.f32.mrf.mxu1  ;;  %1202 = vmatpush1.msra.mxu1 %v737_v4  ;;  %v1710_v4 = vld [vmem:[#allocation5 + $0xd0] sm:$0xff] }
 0x136   : > { %2676 = vmatmul.mubr.msk.f32.vlgmr.msra.gmra.mxu1 %vm400_vm1, %v745_v2  ;;  %2700 = vmatprep.subr.msk.mxu1 %vm413_vm0, %v2685_v3  ;;  %v945_v38 = vadd.f32 %v944_v62, %v3409_v27  ;;  %v933_v27 = vadd.f32 %v3413_v45, %v3401_v15  ;;  %v1062_v25 = vadd.f32 %v1044_v8, %v941_v42  ;;  %v2693_v15 = vld [vmem:[%s3784_s1 + $0x178] sm:$0xf]  ;;  %v2691_v45 = vld [vmem:[%s3784_s1 + $0x168] sm:$0xff]  ;;  %v1706_v8 = vld [vmem:[#allocation5 + $0xb0] sm:$0xff] }
 0x137   : > { %v946_v10 = vpop.f32.mrf.mxu0  ;;  %v1050_v11 = vpop.f32.mrf.mxu1  ;;  %2701 = vmatpush1.msk.msra.mxu1 %vm413_vm0, %v2684_v61  ;;  %1241 = vmatprep.mubr.f32.mxu1 %v2979_v0  ;;  %v1705_v2 = vld [vmem:[#allocation5 + $0xa8] sm:$0xff]  ;;  %v1703_v3 = vld [vmem:[#allocation5 + $0x98] sm:$0xff]  ;;  %v1702_v61 = vld [vmem:[#allocation5 + $0x90] sm:$0xff] }
 0x138   : > { %1393 = vmatprep.subr.mxu1 %v2683_v1  ;;  %v947_v34 = vadd.f32 %v946_v10, %v3411_v31  ;;  %v1701_v62 = vld [vmem:[#allocation5 + $0x88] sm:$0xff]  ;;  %v1699_v1 = vld [vmem:[#allocation5 + $0x78] sm:$0xff]  ;;  %v1738_v42 = vld [vmem:[#allocation5 + $0x1b0] sm:$0xff] }
 0x139   : > { %v950_v16 = vpop.f32.mrf.mxu0  ;;  %v1054_v20 = vpop.f32.mrf.mxu1  ;;  %1394 = vmatpush1.msra.mxu1 %v2682_v9  ;;  %v1698_v9 = vld [vmem:[#allocation5 + $0x70] sm:$0xff]  ;;  %v1697_v10 = vld [vmem:[#allocation5 + $0x68] sm:$0xff] }
 0x13a   : > { %2677 = vmatmul.mubr.msk.f32.gmra.mxu1 %vm400_vm1, %v746_v12  ;;  %1395 = vmatprep.subr.mxu1 %v2681_v13  ;;  %v951_v28 = vadd.f32 %v950_v16, %v855_v33  ;;  %v939_v33 = vadd.f32 %v938_v60, %v3405_v21  ;;  %v1064_v31 = vadd.f32 %v1050_v11, %v947_v34  ;;  %v2708_v60 = vld [vmem:[%s3784_s1 + $0x210] sm:$0xff]  ;;  %v1695_v12 = vld [vmem:[#allocation5 + $0x58] sm:$0xff]  ;;  %v1694_v13 = vld [vmem:[#allocation5 + $0x50] sm:$0xff] }
 0x13b   : > { %v952_v32 = vpop.f32.mrf.mxu0  ;;  %1396 = vmatpush1.msra.mxu1 %v2680_v14  ;;  %1431 = vmatprep.mubr.f32.mxu1 %v2979_v0  ;;  %v1056_v40 = vpop.f32.mrf.mxu1  ;;  %v1059_v21 = vadd.f32 %v3415_v47, %v933_v27  ;;  %v2690_v47 = vld [vmem:[%s3784_s1 + $0x160] sm:$0xff]  ;;  %v1696_v11 = vld [vmem:[#allocation5 + $0x60] sm:$0xff]  ;;  %v1693_v14 = vld [vmem:[#allocation5 + $0x48] sm:$0xff] }
 0x13c   : > { %v953_v37 = vadd.f32 %v952_v32, %v857_v39  ;;  %1397 = vmatprep.subr.mxu1 %v2679_v22  ;;  %v1065_v44 = vadd.f32 %v1054_v20, %v951_v28  ;;  %v1063_v39 = vadd.f32 %v1048_v63, %v945_v38  ;;  %v1700_v63 = vld [vmem:[#allocation5 + $0x80] sm:$0xff]  ;;  %v1691_v20 = vld [vmem:[#allocation5 + $0x38] sm:$0xff]  ;;  %v1690_v22 = vld [vmem:[#allocation5 + $0x30] sm:$0xff] }
 0x13d   : > { %1398 = vmatpush1.msra.mxu1 %v2678_v26  ;;  %v1692_v16 = vld [vmem:[#allocation5 + $0x40] sm:$0xff]  ;;  %v1689_v26 = vld [vmem:[#allocation5 + $0x28] sm:$0xff]  ;;  %v1687_v32 = vld [vmem:[#allocation5 + $0x18] sm:$0xff] }
 0x13e   : > { %v1066_v43 = vadd.f32 %v1056_v40, %v953_v37  ;;  %2702 = vmatmul.mubr.msk.f32.vlgmr.msra.gmra.mxu1 %vm400_vm1, %v3193_v18  ;;  %v1061_v18 = vadd.f32 %v1042_v6, %v939_v33  ;;  %v2706_v6 = vld [vmem:[%s3784_s1 + $0x200] sm:$0xff]  ;;  %v1688_v28 = vld [vmem:[#allocation5 + $0x20] sm:$0xff]  ;;  %v1685_v37 = vld [vmem:[#allocation5 + $0x8] sm:$0xff] }
 0x13f   : > { %1437 = vmatprep.mubr.f32.mxu1 %v2979_v0  ;;  %v1686_v34 = vld [vmem:[#allocation5 + $0x10] sm:$0xff]  ;;  %v1684_v38 = vld [vmem:[#allocation5] sm:$0xff]  ;;  %v1739_v40 = vld [vmem:[#allocation5 + $0x1b8] sm:$0xff] }
 0x140   : > { %2670 = vmatprep.subr.msk.mxu0 %vm413_vm0, %v1066_v43  ;;  %v1737_v43 = vld [vmem:[#allocation5 + $0x1a8] sm:$0xff]  ;;  %v1736_v33 = vld [vmem:[#allocation5 + $0x1a0] sm:$0xff] }
 0x141   : > { %2671 = vmatpush1.msk.msra.mxu0 %vm413_vm0, %v1065_v44  ;;  %v1735_v44 = vld [vmem:[#allocation5 + $0x198] sm:$0xff]  ;;  %v1732_v27 = vld [vmem:[#allocation5 + $0x180] sm:$0xff] }
 0x142   : > { %1108 = vmatprep.subr.mxu0 %v1064_v31  ;;  %2703 = vmatmul.mubr.msk.f32.gmra.mxu1 %vm400_vm1, %v3217_v24  ;;  %v2692_v24 = vld [vmem:[%s3784_s1 + $0x170] sm:$0xf]  ;;  %v1733_v31 = vld [vmem:[#allocation5 + $0x188] sm:$0xff] }
 0x143   : > { %1109 = vmatpush1.msra.mxu0 %v1063_v39  ;;  %1443 = vmatprep.mubr.f32.mxu1 %v2979_v0  ;;  %v1731_v39 = vld [vmem:[#allocation5 + $0x178] sm:$0xff] }
 0x144   : > { %1110 = vmatprep.subr.mxu0 %v1062_v25  ;;  %v1730_v25 = vld [vmem:[#allocation5 + $0x170] sm:$0xff] }
 0x145   : > { %1111 = vmatpush1.msra.mxu0 %v1061_v18  ;;  %v1729_v18 = vld [vmem:[#allocation5 + $0x168] sm:$0xff] }
 0x146   : > { %1112 = vmatprep.subr.mxu0 %v1060_v19  ;;  %2704 = vmatmul.mubr.msk.f32.gmra.mxu1 %vm400_vm1, %v3245_v30  ;;  %v1069_v30 = vld [vmem:[#allocation2 + $0x18] sm:$0x3f]  ;;  %v1728_v19 = vld [vmem:[#allocation5 + $0x160] sm:$0xff] }
 0x147   : > { %1113 = vmatpush1.msra.mxu0 %v1059_v21  ;;  %1449 = vmatprep.mubr.f32.mxu1 %v2979_v0  ;;  %v1727_v21 = vld [vmem:[#allocation5 + $0x158] sm:$0xff] }
 0x148   : > { %2672 = vmatmul.mubr.msk.f32.vlgmr.msra.gmra.mxu0 %vm400_vm1, %v1068_v49  ;;  %2694 = vmatprep.subr.msk.mxu0 %vm413_vm0, %v2693_v15  ;;  %v1726_v49 = vld [vmem:[#allocation5 + $0x150] sm:$0xff] }
 0x149   : > { %2695 = vmatpush1.msk.msra.mxu0 %vm413_vm0, %v2692_v24  ;;  %1152 = vmatprep.mubr.f32.mxu0 %v2979_v0 }
 0x14a   : > { %1298 = vmatprep.subr.mxu0 %v2691_v45  ;;  %2705 = vmatmul.mubr.msk.f32.gmra.mxu1 %vm400_vm1, %v3269_v36  ;;  %v2713_v36 = vld [vmem:[%s3784_s1 + $0x238] sm:$0xf] }
 0x14b   : > { %1299 = vmatpush1.msra.mxu0 %v2690_v47  ;;  %1647 = vmatprep.mubr.f32.mxu1 %v2979_v0 }
 0x14c   : > { %2673 = vmatmul.mubr.msk.f32.gmra.mxu0 %vm400_vm1, %v1069_v30  ;;  %1300 = vmatprep.subr.mxu0 %v2689_v50 }
 0x14d   : > { %1301 = vmatpush1.msra.mxu0 %v2688_v52  ;;  %1336 = vmatprep.mubr.f32.mxu0 %v2979_v0 }
 0x14e   : > { %1302 = vmatprep.subr.mxu0 %v2687_v53 }
 0x14f   : > { %1303 = vmatpush1.msra.mxu0 %v2686_v54 }
 0x150   : > { %2696 = vmatmul.mubr.msk.f32.vlgmr.msra.gmra.mxu0 %vm400_vm1, %v3190_v17  ;;  %2714 = vmatprep.subr.msk.mxu0 %vm413_vm0, %v2713_v36  ;;  %v2707_v17 = vld [vmem:[%s3784_s1 + $0x208] sm:$0xff] }
 0x151   : > { %1342 = vmatprep.mubr.f32.mxu0 %v2979_v0  ;;  %2715 = vmatpush1.msk.msra.mxu0 %vm413_vm0, %v2712_v55 }
 0x152   : > { %1497 = vmatprep.subr.mxu0 %v2711_v57 }
 0x153   : > { %1498 = vmatpush1.msra.mxu0 %v2710_v58 }
 0x154   : > { %2697 = vmatmul.mubr.msk.f32.gmra.mxu0 %vm400_vm1, %v3214_v23  ;;  %1499 = vmatprep.subr.mxu0 %v2709_v59  ;;  %v1715_v23 = vld [vmem:[#allocation5 + $0xf8] sm:$0xff] }
 0x155   : > { %1348 = vmatprep.mubr.f32.mxu0 %v2979_v0  ;;  %1500 = vmatpush1.msra.mxu0 %v2708_v60 }
 0x156   : > { %1501 = vmatprep.subr.mxu0 %v2707_v17 }
 0x157   : > { %1502 = vmatpush1.msra.mxu0 %v2706_v6 }
 0x158   : > { %2698 = vmatmul.mubr.msk.f32.gmra.mxu0 %vm400_vm1, %v3242_v29  ;;  %v1714_v29 = vld [vmem:[#allocation5 + $0xf0] sm:$0xff]  ;;  %1747 = vmatprep.subr.mxu0 %v1715_v23 }
 0x159   : > { %1354 = vmatprep.mubr.f32.mxu0 %v2979_v0 }
 0x15c   : > { %2699 = vmatmul.mubr.msk.f32.gmra.mxu0 %vm400_vm1, %v3266_v35  ;;  %v1713_v35 = vld [vmem:[#allocation5 + $0xe8] sm:$0xff] }
 0x15d   : > { %1535 = vmatprep.mubr.f32.mxu0 %v2979_v0 }
 0x160   : > { %2716 = vmatmul.mubr.msk.f32.vlgmr.msra.gmra.mxu0 %vm400_vm1, %v3288_v41  ;;  %v1712_v41 = vld [vmem:[#allocation5 + $0xe0] sm:$0xff] }
 0x161   : > { %1541 = vmatprep.mubr.f32.mxu0 %v2979_v0  ;;  %1748 = vmatpush1.msra.mxu0 %v1714_v29 }
 0x162   : > { %1749 = vmatprep.subr.mxu0 %v1713_v35 }
 0x163   : > { %1750 = vmatpush1.msra.mxu0 %v1712_v41 }
 0x164   : > { %2717 = vmatmul.mubr.msk.f32.gmra.mxu0 %vm400_vm1, %v3311_v46  ;;  %v1709_v46 = vld [vmem:[#allocation5 + $0xc8] sm:$0xff]  ;;  %1751 = vmatprep.subr.mxu0 %v1711_v7 }
 0x165   : > { %1547 = vmatprep.mubr.f32.mxu0 %v2979_v0  ;;  %1752 = vmatpush1.msra.mxu0 %v1710_v4 }
 0x166   : > { %1753 = vmatprep.subr.mxu0 %v1709_v46 }
 0x167   : > { %1754 = vmatpush1.msra.mxu0 %v1708_v5 }
 0x168   : > { %2718 = vmatmul.mubr.msk.f32.gmra.mxu0 %vm400_vm1, %v3336_v51  ;;  %v1707_v51 = vld [vmem:[#allocation5 + $0xb8] sm:$0xff] }
 0x169   : > { %1553 = vmatprep.mubr.f32.mxu0 %v2979_v0  ;;  %1755 = vmatprep.subr.mxu0 %v1707_v51 }
 0x16a   : > { %1756 = vmatpush1.msra.mxu0 %v1706_v8 }
 0x16b   : > { %1757 = vmatprep.subr.mxu0 %v1705_v2 }
 0x16c   : > { %2719 = vmatmul.mubr.msk.f32.gmra.mxu0 %vm400_vm1, %v3357_v56  ;;  %v1704_v56 = vld [vmem:[#allocation5 + $0xa0] sm:$0xff] }
 0x16d   : > { %1758 = vmatpush1.msra.mxu0 %v1704_v56 }
 0x16e   : > { %1759 = vmatprep.subr.mxu0 %v1703_v3 }
 0x16f   : > { %1760 = vmatpush1.msra.mxu0 %v1702_v61 }
 0x170   : > { %1761 = vmatprep.subr.mxu0 %v1701_v62 }
 0x171   : > { %1762 = vmatpush1.msra.mxu0 %v1700_v63 }
 0x172   : > { %1763 = vmatprep.subr.mxu0 %v1699_v1 }
 0x173   : > { %1764 = vmatpush1.msra.mxu0 %v1698_v9 }
 0x174   : > { %1765 = vmatprep.subr.mxu0 %v1697_v10 }
 0x175   : > { %1766 = vmatpush1.msra.mxu0 %v1696_v11 }
 0x176   : > { %1767 = vmatprep.subr.mxu0 %v1695_v12 }
 0x177   : > { %1768 = vmatpush1.msra.mxu0 %v1694_v13 }
 0x178   : > { %1769 = vmatprep.subr.mxu0 %v1693_v14 }
 0x179   : > { %1770 = vmatpush1.msra.mxu0 %v1692_v16 }
 0x17a   : > { %1771 = vmatprep.subr.mxu0 %v1691_v20 }
 0x17b   : > { %1772 = vmatpush1.msra.mxu0 %v1690_v22 }
 0x17c   : > { %1773 = vmatprep.subr.mxu0 %v1689_v26 }
 0x17d   : > { %1774 = vmatpush1.msra.mxu0 %v1688_v28 }
 0x17e   : > { %1775 = vmatprep.subr.mxu0 %v1687_v32 }
 0x17f   : > { %1776 = vmatpush1.msra.mxu0 %v1686_v34 }
 0x180   : > { %1777 = vmatprep.subr.mxu0 %v1685_v37 }
 0x181   : > { %1778 = vmatpush1.msra.mxu0 %v1684_v38 }
 0x182   : > { %1787 = vmatprep.subr.mxu0 %v1739_v40 }
 0x183   : > { %1788 = vmatpush2.msra.mxu0 %v1738_v42 }
 0x184   : > { %1789 = vmatprep.subr.mxu0 %v1737_v43 }
 0x185   : > { %1790 = vmatpush2.msra.mxu0 %v1736_v33  ;;  %v1569_v33 = vld [vmem:[#allocation2 + $0x20] sm:$0xff] }
 0x186   : > { %1791 = vmatprep.subr.mxu0 %v1735_v44  ;;  %v1857_v44 = vld [vmem:[#allocation5 + $0x2b8] sm:$0xff] }
 0x187   : > { %1792 = vmatpush2.msra.mxu0 %v1734_v48  ;;  %v1856_v48 = vld [vmem:[#allocation5 + $0x2b0] sm:$0xff] }
 0x188   : > { %1793 = vmatprep.subr.mxu0 %v1733_v31  ;;  %v1855_v31 = vld [vmem:[#allocation5 + $0x2a8] sm:$0xff] }
 0x189   : > { %1794 = vmatpush2.msra.mxu0 %v1732_v27  ;;  %v1854_v27 = vld [vmem:[#allocation5 + $0x2a0] sm:$0xff] }
 0x18a   : > { %1795 = vmatprep.subr.mxu0 %v1731_v39  ;;  %v1570_v39 = vld [vmem:[#allocation2 + $0x28] sm:$0x3f] }
 0x18b   : > { %1796 = vmatpush2.msra.mxu0 %v1730_v25  ;;  %v1853_v25 = vld [vmem:[#allocation5 + $0x298] sm:$0xff] }
 0x18c   : > { %1797 = vmatprep.subr.mxu0 %v1729_v18  ;;  %v1852_v18 = vld [vmem:[#allocation5 + $0x290] sm:$0xff] }
 0x18d   : > { %1798 = vmatpush2.msra.mxu0 %v1728_v19  ;;  %v1851_v19 = vld [vmem:[#allocation5 + $0x288] sm:$0xff] }
 0x18e   : > { %1799 = vmatprep.subr.mxu0 %v1727_v21  ;;  %v1850_v21 = vld [vmem:[#allocation5 + $0x280] sm:$0xff] }
 0x18f   : > { %1800 = vmatpush2.msra.mxu0 %v1726_v49  ;;  %v1849_v49 = vld [vmem:[#allocation5 + $0x278] sm:$0xff] }
 0x1f6   : > { %v1237_v15 = vpop.f32.mrf.mxu1 }
 0x1f8   : > { %v1239_v24 = vpop.f32.mrf.mxu1 }
 0x1fa   : > { %v1243_v45 = vpop.f32.mrf.mxu1 }
 0x1fc   : > { %v1245_v52 = vpop.f32.mrf.mxu1 }
 0x1fe   : > { %v1433_v57 = vpop.f32.mrf.mxu1 }
 0x200   : > { %v1435_v17 = vpop.f32.mrf.mxu1 }
 0x202   : > { %v1439_v23 = vpop.f32.mrf.mxu1 }
 0x204   : > { %v1441_v41 = vpop.f32.mrf.mxu1 }
 0x206   : > { %v1445_v46 = vpop.f32.mrf.mxu1 }
 0x208   : > { %v1148_v47 = vpop.f32.mrf.mxu0  ;;  %v1447_v8 = vpop.f32.mrf.mxu1 }
 0x209   : > { %v3553_v30 = vadd.f32 %v1237_v15, %v1148_v47  ;;  %v1848_v15 = vld [vmem:[#allocation5 + $0x270] sm:$0xff]  ;;  %v1845_v47 = vld [vmem:[#allocation5 + $0x258] sm:$0xff] }
 0x20a   : > { %v1150_v50 = vpop.f32.mrf.mxu0  ;;  %v1451_v3 = vpop.f32.mrf.mxu1 }
 0x20b   : > { %v3555_v53 = vadd.f32 %v1239_v24, %v1150_v50  ;;  %v1847_v24 = vld [vmem:[#allocation5 + $0x268] sm:$0xff]  ;;  %v1844_v50 = vld [vmem:[#allocation5 + $0x250] sm:$0xff] }
 0x20c   : > { %v1154_v54 = vpop.f32.mrf.mxu0  ;;  %v1453_v63 = vpop.f32.mrf.mxu1 }
 0x20d   : > { %v3557_v36 = vadd.f32 %v1243_v45, %v1154_v54  ;;  %v1846_v45 = vld [vmem:[#allocation5 + $0x260] sm:$0xff] }
 0x20e   : > { %v1156_v55 = vpop.f32.mrf.mxu0  ;;  %v1842_v54 = vld [vmem:[#allocation5 + $0x240] sm:$0xff] }
 0x20f   : > { %v3559_v58 = vadd.f32 %v1245_v52, %v1156_v55  ;;  %v1843_v52 = vld [vmem:[#allocation5 + $0x248] sm:$0xff]  ;;  %v1841_v55 = vld [vmem:[#allocation5 + $0x238] sm:$0xff] }
 0x210   : > { %v1338_v59 = vpop.f32.mrf.mxu0 }
 0x211   : > { %v1434_v38 = vadd.f32 %v1433_v57, %v1338_v59  ;;  %v1840_v57 = vld [vmem:[#allocation5 + $0x230] sm:$0xff]  ;;  %v1839_v59 = vld [vmem:[#allocation5 + $0x228] sm:$0xff] }
 0x212   : > { %v1340_v60 = vpop.f32.mrf.mxu0 }
 0x213   : > { %v1436_v34 = vadd.f32 %v1435_v17, %v1340_v60  ;;  %v1838_v60 = vld [vmem:[#allocation5 + $0x220] sm:$0xff]  ;;  %v1837_v17 = vld [vmem:[#allocation5 + $0x218] sm:$0xff] }
 0x214   : > { %v1344_v6 = vpop.f32.mrf.mxu0 }
 0x215   : > { %v1440_v28 = vadd.f32 %v1439_v23, %v1344_v6  ;;  %v1836_v6 = vld [vmem:[#allocation5 + $0x210] sm:$0xff]  ;;  %v1835_v23 = vld [vmem:[#allocation5 + $0x208] sm:$0xff] }
 0x216   : > { %v1346_v29 = vpop.f32.mrf.mxu0 }
 0x217   : > { %v1442_v22 = vadd.f32 %v1441_v41, %v1346_v29  ;;  %v1834_v29 = vld [vmem:[#allocation5 + $0x200] sm:$0xff]  ;;  %v1832_v41 = vld [vmem:[#allocation5 + $0x1f0] sm:$0xff] }
 0x218   : > { %v1350_v35 = vpop.f32.mrf.mxu0 }
 0x219   : > { %v1446_v16 = vadd.f32 %v1445_v46, %v1350_v35  ;;  %v1833_v35 = vld [vmem:[#allocation5 + $0x1f8] sm:$0xff] }
 0x21a   : > { %v1352_v7 = vpop.f32.mrf.mxu0  ;;  %v1829_v46 = vld [vmem:[#allocation5 + $0x1d8] sm:$0xff] }
 0x21b   : > { %v1448_v13 = vadd.f32 %v1447_v8, %v1352_v7  ;;  %v1831_v7 = vld [vmem:[#allocation5 + $0x1e8] sm:$0xff]  ;;  %v1826_v8 = vld [vmem:[#allocation5 + $0x1c0] sm:$0xff] }
 0x21c   : > { %v1356_v4 = vpop.f32.mrf.mxu0 }
 0x21d   : > { %v1452_v11 = vadd.f32 %v1451_v3, %v1356_v4  ;;  %v1830_v4 = vld [vmem:[#allocation5 + $0x1e0] sm:$0xff]  ;;  %v1879_v3 = vld [vmem:[#allocation5 + $0x368] sm:$0xff] }
 0x21e   : > { %v1358_v5 = vpop.f32.mrf.mxu0 }
 0x21f   : > { %v1454_v10 = vadd.f32 %v1453_v63, %v1358_v5  ;;  %v1828_v5 = vld [vmem:[#allocation5 + $0x1d0] sm:$0xff] }
 0x220   : > { %v1537_v51 = vpop.f32.mrf.mxu0  ;;  %v1876_v63 = vld [vmem:[#allocation5 + $0x350] sm:$0xff] }
 0x221   : > { %v1560_v43 = vadd.f32 %v1537_v51, %v1434_v38  ;;  %v1827_v51 = vld [vmem:[#allocation5 + $0x1c8] sm:$0xff]  ;;  %v1864_v38 = vld [vmem:[#allocation5 + $0x2f0] sm:$0xff] }
 0x222   : > { %v1539_v2 = vpop.f32.mrf.mxu0 }
 0x223   : > { %v1561_v42 = vadd.f32 %v1539_v2, %v1436_v34  ;;  %v1881_v2 = vld [vmem:[#allocation5 + $0x378] sm:$0xff] }
 0x224   : > { %v1543_v56 = vpop.f32.mrf.mxu0  ;;  %v1865_v34 = vld [vmem:[#allocation5 + $0x2f8] sm:$0xff] }
 0x225   : > { %v1562_v40 = vadd.f32 %v1543_v56, %v1440_v28  ;;  %v1880_v56 = vld [vmem:[#allocation5 + $0x370] sm:$0xff]  ;;  %v1866_v28 = vld [vmem:[#allocation5 + $0x300] sm:$0xff] }
 0x226   : > { %v1545_v61 = vpop.f32.mrf.mxu0 }
 0x227   : > { %v1563_v37 = vadd.f32 %v1545_v61, %v1442_v22  ;;  %v1878_v61 = vld [vmem:[#allocation5 + $0x360] sm:$0xff]  ;;  %v1867_v22 = vld [vmem:[#allocation5 + $0x308] sm:$0xff] }
 0x228   : > { %v1549_v62 = vpop.f32.mrf.mxu0 }
 0x229   : > { %v1564_v32 = vadd.f32 %v1549_v62, %v1446_v16  ;;  %v1877_v62 = vld [vmem:[#allocation5 + $0x358] sm:$0xff]  ;;  %v1868_v16 = vld [vmem:[#allocation5 + $0x310] sm:$0xff] }
 0x22a   : > { %v1551_v1 = vpop.f32.mrf.mxu0 }
 0x22b   : > { %v1565_v26 = vadd.f32 %v1551_v1, %v1448_v13  ;;  %v1875_v1 = vld [vmem:[#allocation5 + $0x348] sm:$0xff]  ;;  %v1870_v13 = vld [vmem:[#allocation5 + $0x320] sm:$0xff] }
 0x22c   : > { %v1555_v9 = vpop.f32.mrf.mxu0 }
 0x22d   : > { %v1566_v20 = vadd.f32 %v1555_v9, %v1452_v11  ;;  %v1874_v9 = vld [vmem:[#allocation5 + $0x340] sm:$0xff]  ;;  %v1872_v11 = vld [vmem:[#allocation5 + $0x330] sm:$0xff] }
 0x22e   : > { %v1557_v12 = vpop.f32.mrf.mxu0 }
 0x22f   : > { %v1567_v14 = vadd.f32 %v1557_v12, %v1454_v10  ;;  %v1873_v10 = vld [vmem:[#allocation5 + $0x338] sm:$0xff]  ;;  %v1871_v12 = vld [vmem:[#allocation5 + $0x328] sm:$0xff] }
 0x231   : > { %2720 = vmatprep.subr.msk.mxu1 %vm413_vm0, %v1567_v14  ;;  %v1869_v14 = vld [vmem:[#allocation5 + $0x318] sm:$0xff] }
 0x232   : > { %2721 = vmatpush1.msk.msra.mxu1 %vm413_vm0, %v1566_v20  ;;  %v1725_v20 = vld [vmem:[#allocation5 + $0x148] sm:$0xff] }
 0x233   : > { %1609 = vmatprep.subr.mxu1 %v1565_v26  ;;  %1801 = vmatprep.subr.mxu0 %v1725_v20  ;;  %v1724_v26 = vld [vmem:[#allocation5 + $0x140] sm:$0xff]  ;;  %v2145_v20 = vld [vmem:[#allocation5 + $0x428] sm:$0xff] }
 0x234   : > { %1610 = vmatpush1.msra.mxu1 %v1564_v32  ;;  %1802 = vmatpush2.msra.mxu0 %v1724_v26  ;;  %v1723_v32 = vld [vmem:[#allocation5 + $0x138] sm:$0xff] }
 0x235   : > { %1611 = vmatprep.subr.mxu1 %v1563_v37  ;;  %1803 = vmatprep.subr.mxu0 %v1723_v32  ;;  %v1722_v37 = vld [vmem:[#allocation5 + $0x130] sm:$0xff]  ;;  %v2143_v26 = vld [vmem:[#allocation5 + $0x418] sm:$0xff]  ;;  %v2141_v32 = vld [vmem:[#allocation5 + $0x408] sm:$0xff] }
 0x236   : > { %1612 = vmatpush1.msra.mxu1 %v1562_v40  ;;  %1804 = vmatpush2.msra.mxu0 %v1722_v37  ;;  %v1721_v40 = vld [vmem:[#allocation5 + $0x128] sm:$0xff]  ;;  %v2139_v37 = vld [vmem:[#allocation5 + $0x3f8] sm:$0xff] }
 0x237   : > { %1613 = vmatprep.subr.mxu1 %v1561_v42  ;;  %v1863_v42 = vld [vmem:[#allocation5 + $0x2e8] sm:$0xff]  ;;  %1805 = vmatprep.subr.mxu0 %v1721_v40 }
 0x238   : > { %1614 = vmatpush1.msra.mxu1 %v1560_v43  ;;  %v1720_v43 = vld [vmem:[#allocation5 + $0x120] sm:$0xff]  ;;  %v2137_v40 = vld [vmem:[#allocation5 + $0x3e8] sm:$0xff] }
 0x239   : > { %2722 = vmatmul.mubr.msk.f32.vlgmr.msra.gmra.mxu1 %vm400_vm1, %v1569_v33  ;;  %1882 = vmatprep.subr.mxu1 %v1857_v44  ;;  %v1862_v33 = vld [vmem:[#allocation5 + $0x2e0] sm:$0xff]  ;;  %v1719_v44 = vld [vmem:[#allocation5 + $0x118] sm:$0xff] }
 0x23a   : > { %1653 = vmatprep.mubr.f32.mxu1 %v2979_v0  ;;  %1883 = vmatpush1.msra.mxu1 %v1856_v48  ;;  %v1861_v48 = vld [vmem:[#allocation5 + $0x2d8] sm:$0xff] }
 0x23b   : > { %1884 = vmatprep.subr.mxu1 %v1855_v31  ;;  %1806 = vmatpush2.msra.mxu0 %v1720_v43  ;;  %v1718_v31 = vld [vmem:[#allocation5 + $0x110] sm:$0xff]  ;;  %v2135_v43 = vld [vmem:[#allocation5 + $0x3d8] sm:$0xff] }
 0x23c   : > { %1885 = vmatpush1.msra.mxu1 %v1854_v27  ;;  %1807 = vmatprep.subr.mxu0 %v1719_v44  ;;  %v1860_v27 = vld [vmem:[#allocation5 + $0x2d0] sm:$0xff]  ;;  %v2133_v44 = vld [vmem:[#allocation5 + $0x3c8] sm:$0xff] }
 0x23d   : > { %2723 = vmatmul.mubr.msk.f32.gmra.mxu1 %vm400_vm1, %v1570_v39  ;;  %1886 = vmatprep.subr.mxu1 %v1853_v25  ;;  %v1717_v39 = vld [vmem:[#allocation5 + $0x108] sm:$0xff] }
 0x23e   : > { %1887 = vmatpush1.msra.mxu1 %v1852_v18  ;;  %1808 = vmatpush2.msra.mxu0 %v1718_v31  ;;  %v1859_v25 = vld [vmem:[#allocation5 + $0x2c8] sm:$0xff]  ;;  %v1716_v18 = vld [vmem:[#allocation5 + $0x100] sm:$0xff]  ;;  %v2131_v31 = vld [vmem:[#allocation5 + $0x3b8] sm:$0xff] }
 0x23f   : > { %1888 = vmatprep.subr.mxu1 %v1851_v19  ;;  %1809 = vmatprep.subr.mxu0 %v1717_v39  ;;  %v1858_v19 = vld [vmem:[#allocation5 + $0x2c0] sm:$0xff]  ;;  %v2129_v39 = vld [vmem:[#allocation5 + $0x3a8] sm:$0xff] }
 0x240   : > { %1889 = vmatpush1.msra.mxu1 %v1850_v21  ;;  %1810 = vmatpush2.msra.mxu0 %v1716_v18  ;;  %v1666_v21 = vlaneseq  ;;  %v2127_v18 = vld [vmem:[#allocation5 + $0x398] sm:$0xff] }
 0x241   : > { %1890 = vmatprep.subr.mxu1 %v1849_v49 }
 0x242   : > { %1891 = vmatpush1.msra.mxu1 %v1848_v15  ;;  %v3566_v49 = vshrl.u32 %v1666_v21, 7  ;;  %v2125_v21 = vld [vmem:[#allocation5 + $0x388] sm:$0xff] }
 0x243   : > { %1892 = vmatprep.subr.mxu1 %v1847_v24  ;;  %v1664_v24 = vld [vmem:[%s3786_s3] sm:$0x3] }
 0x244   : > { %1893 = vmatpush1.msra.mxu1 %v1846_v45  ;;  %v1668_v15 = vsub.s32 0, %v3566_v49  ;;  %v1672_v45 = vsub.s32 1, %v3566_v49 }
 0x245   : > { %1894 = vmatprep.subr.mxu1 %v1845_v47 }
 0x246   : > { %1895 = vmatpush1.msra.mxu1 %v1844_v50  ;;  %v1669_v50 = vrot.slane %v1664_v24, %v1668_v15 }
 0x247   : > { %1896 = vmatprep.subr.mxu1 %v1843_v52 }
 0x248   : > { %1897 = vmatpush1.msra.mxu1 %v1842_v54  ;;  %v1673_v54 = vrot.slane %v1664_v24, %v1672_v45  ;;  %v2124_v24 = vld [vmem:[#allocation5 + $0x380] sm:$0xff] }
 0x249   : > { %1898 = vmatprep.subr.mxu1 %v1841_v55 }
 0x24a   : > { %1899 = vmatpush1.msra.mxu1 %v1840_v57 }
 0x24b   : > { %1900 = vmatprep.subr.mxu1 %v1839_v59 }
 0x24c   : > { %1901 = vmatpush1.msra.mxu1 %v1838_v60 }
 0x24d   : > { %1902 = vmatprep.subr.mxu1 %v1837_v17 }
 0x24e   : > { %1903 = vmatpush1.msra.mxu1 %v1836_v6 }
 0x24f   : > { %1904 = vmatprep.subr.mxu1 %v1835_v23 }
 0x250   : > { %1905 = vmatpush1.msra.mxu1 %v1834_v29 }
 0x251   : > { %1906 = vmatprep.subr.mxu1 %v1833_v35 }
 0x252   : > { %1907 = vmatpush1.msra.mxu1 %v1832_v41 }
 0x253   : > { %1908 = vmatprep.subr.mxu1 %v1831_v7 }
 0x254   : > { %1909 = vmatpush1.msra.mxu1 %v1830_v4 }
 0x255   : > { %1910 = vmatprep.subr.mxu1 %v1829_v46 }
 0x256   : > { %1911 = vmatpush1.msra.mxu1 %v1828_v5 }
 0x257   : > { %1912 = vmatprep.subr.mxu1 %v1827_v51 }
 0x258   : > { %1913 = vmatpush1.msra.mxu1 %v1826_v8 }
 0x259   : > { %1922 = vmatprep.subr.mxu1 %v1881_v2 }
 0x25a   : > { %1923 = vmatpush2.msra.mxu1 %v1880_v56 }
 0x25b   : > { %1924 = vmatprep.subr.mxu1 %v1879_v3  ;;  %v1960_v3 = vld [vmem:[#allocation7 + $0x8] sm:$0x7f] }
 0x25c   : > { %1925 = vmatpush2.msra.mxu1 %v1878_v61  ;;  %v2155_v61 = vld [vmem:[#allocation5 + $0x478] sm:$0xff] }
 0x25d   : > { %1926 = vmatprep.subr.mxu1 %v1877_v62  ;;  %v2154_v62 = vld [vmem:[#allocation5 + $0x470] sm:$0xff] }
 0x25e   : > { %1927 = vmatpush2.msra.mxu1 %v1876_v63  ;;  %v2153_v63 = vld [vmem:[#allocation5 + $0x468] sm:$0xff] }
 0x25f   : > { %1928 = vmatprep.subr.mxu1 %v1875_v1  ;;  %v1824_v1 = vld [vmem:[#allocation7] sm:$0x7f] }
 0x260   : > { %1929 = vmatpush2.msra.mxu1 %v1874_v9  ;;  %v2152_v9 = vld [vmem:[#allocation5 + $0x460] sm:$0xff] }
 0x261   : > { %1930 = vmatprep.subr.mxu1 %v1873_v10  ;;  %v2151_v10 = vld [vmem:[#allocation5 + $0x458] sm:$0xff] }
 0x262   : > { %1931 = vmatpush2.msra.mxu1 %v1872_v11  ;;  %v2150_v11 = vld [vmem:[#allocation5 + $0x450] sm:$0xff] }
 0x263   : > { %1932 = vmatprep.subr.mxu1 %v1871_v12  ;;  %v2149_v12 = vld [vmem:[#allocation5 + $0x448] sm:$0xff] }
 0x264   : > { %1933 = vmatpush2.msra.mxu1 %v1870_v13  ;;  %v2148_v13 = vld [vmem:[#allocation5 + $0x440] sm:$0xff] }
 0x265   : > { %1934 = vmatprep.subr.mxu1 %v1869_v14  ;;  %v2147_v14 = vld [vmem:[#allocation5 + $0x438] sm:$0xff] }
 0x266   : > { %1935 = vmatpush2.msra.mxu1 %v1868_v16  ;;  %v2146_v16 = vld [vmem:[#allocation5 + $0x430] sm:$0xff] }
 0x267   : > { %1936 = vmatprep.subr.mxu1 %v1867_v22  ;;  %v2144_v22 = vld [vmem:[#allocation5 + $0x420] sm:$0xff] }
 0x268   : > { %1937 = vmatpush2.msra.mxu1 %v1866_v28  ;;  %v2142_v28 = vld [vmem:[#allocation5 + $0x410] sm:$0xff] }
 0x269   : > { %1938 = vmatprep.subr.mxu1 %v1865_v34  ;;  %v2140_v34 = vld [vmem:[#allocation5 + $0x400] sm:$0xff] }
 0x26a   : > { %1939 = vmatpush2.msra.mxu1 %v1864_v38  ;;  %v2138_v38 = vld [vmem:[#allocation5 + $0x3f0] sm:$0xff] }
 0x26b   : > { %1940 = vmatprep.subr.mxu1 %v1863_v42  ;;  %v2136_v42 = vld [vmem:[#allocation5 + $0x3e0] sm:$0xff] }
 0x26c   : > { %1941 = vmatpush2.msra.mxu1 %v1862_v33  ;;  %v2134_v33 = vld [vmem:[#allocation5 + $0x3d0] sm:$0xff] }
 0x26d   : > { %1942 = vmatprep.subr.mxu1 %v1861_v48  ;;  %v2132_v48 = vld [vmem:[#allocation5 + $0x3c0] sm:$0xff] }
 0x26e   : > { %1943 = vmatpush2.msra.mxu1 %v1860_v27  ;;  %v2130_v27 = vld [vmem:[#allocation5 + $0x3b0] sm:$0xff] }
 0x26f   : > { %1944 = vmatprep.subr.mxu1 %v1859_v25  ;;  %v2128_v25 = vld [vmem:[#allocation5 + $0x3a0] sm:$0xff] }
 0x270   : > { %1945 = vmatpush2.msra.mxu1 %v1858_v19  ;;  %v2126_v19 = vld [vmem:[#allocation5 + $0x390] sm:$0xff] }
 0x2f9   : > { %v1649_v47 = vpop.f32.mrf.mxu1 }
 0x2fa   : > { %v1660_v52 = vadd.f32 %v1649_v47, %v3553_v30  ;;  %v2179_v47 = vld [vmem:[#allocation5 + $0x538] sm:$0xff] }
 0x2fb   : > { %v1651_v55 = vpop.f32.mrf.mxu1 }
 0x2fc   : > { %v1661_v57 = vadd.f32 %v1651_v55, %v3555_v53  ;;  %v1676_v59 = vadd.f32 %v1669_v50, %v1660_v52  ;;  %v2177_v52 = vld [vmem:[#allocation5 + $0x528] sm:$0xff]  ;;  %v2175_v55 = vld [vmem:[#allocation5 + $0x518] sm:$0xff] }
 0x2fd   : > { %v1655_v60 = vpop.f32.mrf.mxu1 }
 0x2fe   : > { %v1677_v17 = vadd.f32 %v1673_v54, %v1661_v57  ;;  %v1662_v6 = vadd.f32 %v1655_v60, %v3557_v36  ;;  %v3581_v41 = vmax.f32 %v1676_v59, 0.0  ;;  %v2174_v57 = vld [vmem:[#allocation5 + $0x510] sm:$0xff]  ;;  %v2173_v59 = vld [vmem:[#allocation5 + $0x508] sm:$0xff]  ;;  %v2172_v60 = vld [vmem:[#allocation5 + $0x500] sm:$0xff] }
 0x2ff   : > { %v1657_v23 = vpop.f32.mrf.mxu1 }
 0x300   : > { %v1681_v29 = vmax.f32 %v1677_v17, 0.0  ;;  %v1663_v35 = vadd.f32 %v1657_v23, %v3559_v58  ;;  %v1678_v7 = vadd.f32 %v1669_v50, %v1662_v6  ;;  %v2178_v50 = vld [vmem:[#allocation5 + $0x530] sm:$0xff]  ;;  %v2171_v17 = vld [vmem:[#allocation5 + $0x4f8] sm:$0xff]  ;;  %v2169_v23 = vld [vmem:[#allocation5 + $0x4e8] sm:$0xff] }
 0x301   : > { %v2170_v6 = vld [vmem:[#allocation5 + $0x4f0] sm:$0xff] }
 0x302   : > { %v1679_v30 = vadd.f32 %v1673_v54, %v1663_v35  ;;  %2724 = vmatprep.mubr.msk.f32.mxu0 %vm1740_vm2, %v1681_v29  ;;  %2726 = vmatprep.mubr.msk.f32.mxu1 %vm1740_vm2, %v1681_v29  ;;  %v3589_v36 = vmax.f32 %v1678_v7, 0.0  ;;  %v2176_v54 = vld [vmem:[#allocation5 + $0x520] sm:$0xff]  ;;  %v2167_v35 = vld [vmem:[#allocation5 + $0x4d8] sm:$0xff]  ;;  %v2166_v7 = vld [vmem:[#allocation5 + $0x4d0] sm:$0xff] }
 0x303   : > { %1812 = vmatmul.mubr.f32.vlgmr.msra.gmra.mxu0 %v3581_v41  ;;  %1947 = vmatmul.mubr.f32.vlgmr.msra.gmra.mxu1 %v3581_v41 }
 0x304   : > { %v3587_v53 = vmax.f32 %v1679_v30, 0.0  ;;  %v2165_v30 = vld [vmem:[#allocation5 + $0x4c8] sm:$0xff] }
 0x306   : > { %2725 = vmatprep.mubr.msk.f32.mxu0 %vm1740_vm2, %v3587_v53  ;;  %2727 = vmatprep.mubr.msk.f32.mxu1 %vm1740_vm2, %v3587_v53 }
 0x307   : > { %1818 = vmatmul.mubr.f32.gmra.mxu0 %v3589_v36  ;;  %1953 = vmatmul.mubr.f32.gmra.mxu1 %v3589_v36 }
 0x308   : > { %2036 = vmatprep.mubr.f32.mxu0 %v2979_v0  ;;  %2116 = vmatprep.mubr.f32.mxu1 %v2979_v0 }
 0x3c3   : > { %v1813_v58 = vpop.f32.mrf.mxu0  ;;  %v1948_v4 = vpop.f32.mrf.mxu1 }
 0x3c5   : > { %v1815_v46 = vpop.f32.mrf.mxu0  ;;  %v1950_v5 = vpop.f32.mrf.mxu1 }
 0x3c7   : > { %v1819_v51 = vpop.f32.mrf.mxu0  ;;  %v1954_v8 = vpop.f32.mrf.mxu1 }
 0x3c9   : > { %v1821_v2 = vpop.f32.mrf.mxu0  ;;  %v1956_v56 = vpop.f32.mrf.mxu1 }
 0x3ca   : > { %2728 = vmatprep.subr.msk.mxu0 %vm1965_vm3, %v1956_v56  ;;  %2731 = vmatprep.subr.msk.mxu1 %vm1965_vm3, %v1821_v2  ;;  %v2158_v2 = vld [vmem:[#allocation5 + $0x490] sm:$0xff]  ;;  %v2157_v56 = vld [vmem:[#allocation5 + $0x488] sm:$0xff] }
 0x3cb   : > { %2729 = vmatpush1.msk.msra.mxu0 %vm1965_vm3, %v1954_v8  ;;  %2732 = vmatpush1.msk.msra.mxu1 %vm1965_vm3, %v1819_v51  ;;  %v2160_v51 = vld [vmem:[#allocation5 + $0x4a0] sm:$0xff]  ;;  %v2159_v8 = vld [vmem:[#allocation5 + $0x498] sm:$0xff] }
 0x3cc   : > { %2002 = vmatprep.subr.mxu0 %v1950_v5  ;;  %2082 = vmatprep.subr.mxu1 %v1815_v46  ;;  %v2162_v46 = vld [vmem:[#allocation5 + $0x4b0] sm:$0xff]  ;;  %v2161_v5 = vld [vmem:[#allocation5 + $0x4a8] sm:$0xff] }
 0x3cd   : > { %2003 = vmatpush1.msra.mxu0 %v1948_v4  ;;  %2083 = vmatpush1.msra.mxu1 %v1813_v58  ;;  %v2164_v58 = vld [vmem:[#allocation5 + $0x4c0] sm:$0xff]  ;;  %v2163_v4 = vld [vmem:[#allocation5 + $0x4b8] sm:$0xff] }
 0x3ce   : > { %2730 = vmatmul.mubr.msk.f32.vlgmr.msra.gmra.mxu0 %vm1961_vm4, %v1960_v3  ;;  %2180 = vmatprep.subr.mxu0 %v2155_v61  ;;  %v2156_v3 = vld [vmem:[#allocation5 + $0x480] sm:$0xff] }
 0x3cf   : > { %2181 = vmatpush1.msra.mxu0 %v2154_v62  ;;  %2734 = vmatprep.mubr.msk.f32.mxu0 %vm1740_vm2, %v1681_v29  ;;  %v2168_v29 = vld [vmem:[#allocation5 + $0x4e0] sm:$0xff] }
 0x3d0   : > { %2182 = vmatprep.subr.mxu0 %v2153_v63  ;;  %2733 = vmatmul.mubr.msk.f32.vlgmr.msra.gmra.mxu1 %vm1961_vm4, %v1824_v1 }
 0x3d1   : > { %2183 = vmatpush1.msra.mxu0 %v2152_v9  ;;  %2332 = vmatprep.mubr.f32.mxu1 %v2979_v0 }
 0x3d2   : > { %2184 = vmatprep.subr.mxu0 %v2151_v10 }
 0x3d3   : > { %2185 = vmatpush1.msra.mxu0 %v2150_v11  ;;  %v2258_v11 = vld [vmem:[#allocation7 + $0x10] sm:$0x7f] }
 0x3d4   : > { %2186 = vmatprep.subr.mxu0 %v2149_v12  ;;  %v2369_v12 = vld [vmem:[%s3790_s7 + $0x60] sm:$0xff] }
 0x3d5   : > { %2187 = vmatpush1.msra.mxu0 %v2148_v13  ;;  %v2368_v13 = vld [vmem:[%s3790_s7 + $0x58] sm:$0xff] }
 0x3d6   : > { %2188 = vmatprep.subr.mxu0 %v2147_v14  ;;  %v2367_v14 = vld [vmem:[%s3790_s7 + $0x50] sm:$0xff] }
 0x3d7   : > { %2189 = vmatpush1.msra.mxu0 %v2146_v16  ;;  %v2366_v16 = vld [vmem:[%s3790_s7 + $0x48] sm:$0xff] }
 0x3d8   : > { %2190 = vmatprep.subr.mxu0 %v2145_v20  ;;  %v2365_v20 = vld [vmem:[%s3790_s7 + $0x40] sm:$0xff] }
 0x3d9   : > { %2191 = vmatpush1.msra.mxu0 %v2144_v22  ;;  %v2364_v22 = vld [vmem:[%s3790_s7 + $0x38] sm:$0xff] }
 0x3da   : > { %2192 = vmatprep.subr.mxu0 %v2143_v26  ;;  %v2363_v26 = vld [vmem:[%s3790_s7 + $0x30] sm:$0xff] }
 0x3db   : > { %2193 = vmatpush1.msra.mxu0 %v2142_v28  ;;  %v2362_v28 = vld [vmem:[%s3790_s7 + $0x28] sm:$0xff] }
 0x3dc   : > { %2194 = vmatprep.subr.mxu0 %v2141_v32  ;;  %v2361_v32 = vld [vmem:[%s3790_s7 + $0x20] sm:$0xff] }
 0x3dd   : > { %2195 = vmatpush1.msra.mxu0 %v2140_v34  ;;  %v2360_v34 = vld [vmem:[%s3790_s7 + $0x18] sm:$0xff] }
 0x3de   : > { %2196 = vmatprep.subr.mxu0 %v2139_v37  ;;  %v2359_v37 = vld [vmem:[%s3790_s7 + $0x10] sm:$0xff] }
 0x3df   : > { %2197 = vmatpush1.msra.mxu0 %v2138_v38  ;;  %v2358_v38 = vld [vmem:[%s3790_s7 + $0x8] sm:$0xff] }
 0x3e0   : > { %2198 = vmatprep.subr.mxu0 %v2137_v40  ;;  %v2357_v40 = vld [vmem:[%s3790_s7] sm:$0xff] }
 0x3e1   : > { %2199 = vmatpush1.msra.mxu0 %v2136_v42  ;;  %v2384_v42 = vld [vmem:[%s3790_s7 + $0xd8] sm:$0xff] }
 0x3e2   : > { %2200 = vmatprep.subr.mxu0 %v2135_v43  ;;  %v2383_v43 = vld [vmem:[%s3790_s7 + $0xd0] sm:$0xff] }
 0x3e3   : > { %2201 = vmatpush1.msra.mxu0 %v2134_v33  ;;  %v2382_v33 = vld [vmem:[%s3790_s7 + $0xc8] sm:$0xff] }
 0x3e4   : > { %2202 = vmatprep.subr.mxu0 %v2133_v44  ;;  %v2381_v44 = vld [vmem:[%s3790_s7 + $0xc0] sm:$0xff] }
 0x3e5   : > { %2203 = vmatpush1.msra.mxu0 %v2132_v48  ;;  %v2380_v48 = vld [vmem:[%s3790_s7 + $0xb8] sm:$0xff] }
 0x3e6   : > { %2204 = vmatprep.subr.mxu0 %v2131_v31  ;;  %v2379_v31 = vld [vmem:[%s3790_s7 + $0xb0] sm:$0xff] }
 0x3e7   : > { %2205 = vmatpush1.msra.mxu0 %v2130_v27  ;;  %v2378_v27 = vld [vmem:[%s3790_s7 + $0xa8] sm:$0xff] }
 0x3e8   : > { %2206 = vmatprep.subr.mxu0 %v2129_v39  ;;  %v2377_v39 = vld [vmem:[%s3790_s7 + $0xa0] sm:$0xff] }
 0x3e9   : > { %2207 = vmatpush1.msra.mxu0 %v2128_v25  ;;  %v2376_v25 = vld [vmem:[%s3790_s7 + $0x98] sm:$0xff] }
 0x3ea   : > { %2208 = vmatprep.subr.mxu0 %v2127_v18  ;;  %v2375_v18 = vld [vmem:[%s3790_s7 + $0x90] sm:$0xff] }
 0x3eb   : > { %2209 = vmatpush1.msra.mxu0 %v2126_v19  ;;  %v2374_v19 = vld [vmem:[%s3790_s7 + $0x88] sm:$0xff] }
 0x3ec   : > { %2210 = vmatprep.subr.mxu0 %v2125_v21  ;;  %v2373_v21 = vld [vmem:[%s3790_s7 + $0x80] sm:$0xff] }
 0x3ed   : > { %2211 = vmatpush1.msra.mxu0 %v2124_v24 }
 0x3ee   : > { %2220 = vmatprep.subr.mxu0 %v2179_v47  ;;  %v2341_v47 = vld [vmem:[%s3789_s6] sm:$0x3] }
 0x3ef   : > { %2221 = vmatpush2.msra.mxu0 %v2178_v50 }
 0x3f0   : > { %2222 = vmatprep.subr.mxu0 %v2177_v52 }
 0x3f1   : > { %2223 = vmatpush2.msra.mxu0 %v2176_v54 }
 0x3f2   : > { %2224 = vmatprep.subr.mxu0 %v2175_v55  ;;  %v2346_v55 = vrot.slane %v2341_v47, %v1668_v15 }
 0x3f3   : > { %2225 = vmatpush2.msra.mxu0 %v2174_v57 }
 0x3f4   : > { %2226 = vmatprep.subr.mxu0 %v2173_v59 }
 0x3f5   : > { %2227 = vmatpush2.msra.mxu0 %v2172_v60  ;;  %v2350_v60 = vrot.slane %v2341_v47, %v1672_v45 }
 0x3f6   : > { %2228 = vmatprep.subr.mxu0 %v2171_v17 }
 0x3f7   : > { %2229 = vmatpush2.msra.mxu0 %v2170_v6 }
 0x3f8   : > { %2230 = vmatprep.subr.mxu0 %v2169_v23 }
 0x3f9   : > { %2231 = vmatpush2.msra.mxu0 %v2168_v29 }
 0x3fa   : > { %2232 = vmatprep.subr.mxu0 %v2167_v35 }
 0x3fb   : > { %2233 = vmatpush2.msra.mxu0 %v2166_v7 }
 0x3fc   : > { %2234 = vmatprep.subr.mxu0 %v2165_v30 }
 0x3fd   : > { %2235 = vmatpush2.msra.mxu0 %v2164_v58 }
 0x3fe   : > { %2236 = vmatprep.subr.mxu0 %v2163_v4 }
 0x3ff   : > { %2237 = vmatpush2.msra.mxu0 %v2162_v46 }
 0x400   : > { %2238 = vmatprep.subr.mxu0 %v2161_v5  ;;  %v2466_v5 = vld [vmem:[%s3791_s8] sm:$0x1] }
 0x401   : > { %2239 = vmatpush2.msra.mxu0 %v2160_v51 }
 0x402   : > { %2240 = vmatprep.subr.mxu0 %v2159_v8 }
 0x403   : > { %2241 = vmatpush2.msra.mxu0 %v2158_v2 }
 0x404   : > { %2242 = vmatprep.subr.mxu0 %v2157_v56 }
 0x405   : > { %2243 = vmatpush2.msra.mxu0 %v2156_v3 }
 0x406   : > { %2245 = vmatmul.mubr.f32.vlgmr.msra.gmra.mxu0 %v3581_v41  ;;  %v2372_v41 = vld [vmem:[%s3790_s7 + $0x78] sm:$0xff] }
 0x407   : > { %2735 = vmatprep.mubr.msk.f32.mxu0 %vm1740_vm2, %v3587_v53  ;;  %v2371_v53 = vld [vmem:[%s3790_s7 + $0x70] sm:$0xff] }
 0x40a   : > { %2251 = vmatmul.mubr.f32.gmra.mxu0 %v3589_v36  ;;  %v2370_v36 = vld [vmem:[%s3790_s7 + $0x68] sm:$0xff] }
 0x48e   : > { %v3611_v61 = vpop.f32.mrf.mxu0 }
 0x490   : > { %v3613_v62 = vpop.f32.mrf.mxu0  ;;  %v2118_v24 = vpop.f32.mrf.mxu1 }
 0x491   : > { %v2119_v52 = vadd.f32 %v2118_v24, %v3611_v61 }
 0x492   : > { %v2120_v50 = vpop.f32.mrf.mxu1 }
 0x493   : > { %v2121_v57 = vadd.f32 %v2120_v50, %v3613_v62 }
 0x4c6   : > { %v2246_v63 = vpop.f32.mrf.mxu0 }
 0x4c8   : > { %v2248_v1 = vpop.f32.mrf.mxu0 }
 0x4ca   : > { %v2252_v9 = vpop.f32.mrf.mxu0 }
 0x4cc   : > { %v2254_v10 = vpop.f32.mrf.mxu0 }
 0x4cd   : > { %2736 = vmatprep.subr.msk.mxu1 %vm1965_vm3, %v2254_v10 }
 0x4ce   : > { %2737 = vmatpush1.msk.msra.mxu1 %vm1965_vm3, %v2252_v9 }
 0x4cf   : > { %2298 = vmatprep.subr.mxu1 %v2248_v1 }
 0x4d0   : > { %2299 = vmatpush1.msra.mxu1 %v2246_v63 }
 0x4d1   : > { %2738 = vmatmul.mubr.msk.f32.vlgmr.msra.gmra.mxu1 %vm1961_vm4, %v2258_v11  ;;  %2388 = vmatprep.subr.mxu1 %v2979_v0 }
 0x4d2   : > { %2389 = vmatpush1.msra.mxu1 %v2372_v41 }
 0x4d3   : > { %2390 = vmatprep.subr.mxu1 %v2979_v0 }
 0x4d4   : > { %2391 = vmatpush1.msra.mxu1 %v2371_v53 }
 0x4d5   : > { %2392 = vmatprep.subr.mxu1 %v2979_v0 }
 0x4d6   : > { %2393 = vmatpush1.msra.mxu1 %v2370_v36 }
 0x4d7   : > { %2394 = vmatprep.subr.mxu1 %v2979_v0 }
 0x4d8   : > { %2395 = vmatpush1.msra.mxu1 %v2369_v12 }
 0x4d9   : > { %2396 = vmatprep.subr.mxu1 %v2979_v0 }
 0x4da   : > { %2397 = vmatpush1.msra.mxu1 %v2368_v13 }
 0x4db   : > { %2398 = vmatprep.subr.mxu1 %v2979_v0 }
 0x4dc   : > { %2399 = vmatpush1.msra.mxu1 %v2367_v14 }
 0x4dd   : > { %2400 = vmatprep.subr.mxu1 %v2979_v0 }
 0x4de   : > { %2401 = vmatpush1.msra.mxu1 %v2366_v16 }
 0x4df   : > { %2402 = vmatprep.subr.mxu1 %v2979_v0 }
 0x4e0   : > { %2403 = vmatpush1.msra.mxu1 %v2365_v20 }
 0x4e1   : > { %2404 = vmatprep.subr.mxu1 %v2979_v0 }
 0x4e2   : > { %2405 = vmatpush1.msra.mxu1 %v2364_v22 }
 0x4e3   : > { %2406 = vmatprep.subr.mxu1 %v2979_v0 }
 0x4e4   : > { %2407 = vmatpush1.msra.mxu1 %v2363_v26 }
 0x4e5   : > { %2408 = vmatprep.subr.mxu1 %v2979_v0 }
 0x4e6   : > { %2409 = vmatpush1.msra.mxu1 %v2362_v28 }
 0x4e7   : > { %2410 = vmatprep.subr.mxu1 %v2979_v0 }
 0x4e8   : > { %2411 = vmatpush1.msra.mxu1 %v2361_v32 }
 0x4e9   : > { %2412 = vmatprep.subr.mxu1 %v2979_v0 }
 0x4ea   : > { %2413 = vmatpush1.msra.mxu1 %v2360_v34 }
 0x4eb   : > { %2414 = vmatprep.subr.mxu1 %v2979_v0 }
 0x4ec   : > { %2415 = vmatpush1.msra.mxu1 %v2359_v37 }
 0x4ed   : > { %2416 = vmatprep.subr.mxu1 %v2979_v0 }
 0x4ee   : > { %2417 = vmatpush1.msra.mxu1 %v2358_v38 }
 0x4ef   : > { %2418 = vmatprep.subr.mxu1 %v2979_v0 }
 0x4f0   : > { %2419 = vmatpush1.msra.mxu1 %v2357_v40 }
 0x4f1   : > { %2428 = vmatprep.subr.mxu1 %v2979_v0 }
 0x4f2   : > { %2429 = vmatpush2.msra.mxu1 %v2384_v42 }
 0x4f3   : > { %2430 = vmatprep.subr.mxu1 %v2979_v0 }
 0x4f4   : > { %2431 = vmatpush2.msra.mxu1 %v2383_v43 }
 0x4f5   : > { %2432 = vmatprep.subr.mxu1 %v2979_v0 }
 0x4f6   : > { %2433 = vmatpush2.msra.mxu1 %v2382_v33 }
 0x4f7   : > { %2434 = vmatprep.subr.mxu1 %v2979_v0 }
 0x4f8   : > { %2435 = vmatpush2.msra.mxu1 %v2381_v44 }
 0x4f9   : > { %2436 = vmatprep.subr.mxu1 %v2979_v0 }
 0x4fa   : > { %2437 = vmatpush2.msra.mxu1 %v2380_v48 }
 0x4fb   : > { %2438 = vmatprep.subr.mxu1 %v2979_v0 }
 0x4fc   : > { %2439 = vmatpush2.msra.mxu1 %v2379_v31 }
 0x4fd   : > { %2440 = vmatprep.subr.mxu1 %v2979_v0 }
 0x4fe   : > { %2441 = vmatpush2.msra.mxu1 %v2378_v27 }
 0x4ff   : > { %2442 = vmatprep.subr.mxu1 %v2979_v0 }
 0x500   : > { %2443 = vmatpush2.msra.mxu1 %v2377_v39 }
 0x501   : > { %2444 = vmatprep.subr.mxu1 %v2979_v0 }
 0x502   : > { %2445 = vmatpush2.msra.mxu1 %v2376_v25 }
 0x503   : > { %2446 = vmatprep.subr.mxu1 %v2979_v0 }
 0x504   : > { %2447 = vmatpush2.msra.mxu1 %v2375_v18 }
 0x505   : > { %2448 = vmatprep.subr.mxu1 %v2979_v0 }
 0x506   : > { %2449 = vmatpush2.msra.mxu1 %v2374_v19 }
 0x507   : > { %2450 = vmatprep.subr.mxu1 %v2979_v0 }
 0x508   : > { %2451 = vmatpush2.msra.mxu1 %v2373_v21 }
 0x591   : > { %v2334_v54 = vpop.f32.mrf.mxu1 }
 0x592   : > { %v2339_v59 = vadd.f32 %v2334_v54, %v2119_v52 }
 0x593   : > { %v2336_v0 = vpop.f32.mrf.mxu1 }
 0x594   : > { %v2340_v17 = vadd.f32 %v2336_v0, %v2121_v57  ;;  %v2353_v6 = vadd.f32 %v2346_v55, %v2339_v59 }
 0x596   : > { %v2354_v23 = vadd.f32 %v2350_v60, %v2340_v17  ;;  %v2355_v35 = vmax.f32 %v2353_v6, 0.0 }
 0x598   : > { %v2356_v29 = vmax.f32 %v2354_v23, 0.0 }
 0x59a   : > { %2739 = vmatprep.mubr.msk.f32.mxu1 %vm1740_vm2, %v2356_v29 }
 0x59b   : > { %2453 = vmatmul.mubr.f32.vlgmr.msra.gmra.mxu1 %v2355_v35 }
 0x65b   : > { %v2454_v7 = vpop.f32.mrf.mxu1 }
 0x65c   : > { %v2459_v30 = vsel %vm2458_vm5, %v2454_v7, 0.0 }
 0x65d   : > { %v2460_v15 = vrot.slane %v2459_v30, 4  ;;  %v2456_v58 = vpop.f32.mrf.mxu1 }
 0x65f   : > { %v2461_v4 = vadd.f32 %v2460_v15, %v2459_v30 }
 0x661   : > { %v2462_v46 = vrot.slane %v2461_v4, 2 }
 0x663   : > { %v2463_v49 = vadd.f32 %v2462_v46, %v2461_v4 }
 0x665   : > { %v2464_v45 = vrot.slane %v2463_v49, 1 }
 0x667   : > { %v2465_v51 = vadd.f32 %v2464_v45, %v2463_v49 }
 0x669   : > { %v2467_v8 = vadd.f32 %v2466_v5, %v2465_v51 }
 0x66b   : > { %v2740_v2 = vmul.f32 -1.442695, %v2467_v8 }
 0x66d   : > { %2820 = vpow2.f32 %v2740_v2 }
 0x67a   : > { %v2821_v56 = vpop.eup %2820 }
 0x67b   : > { %v2471_v3 = vadd.f32 1.0, %v2821_v56 }
 0x67d   : > { %2822 = vrcp.f32 %v2471_v3 }
 0x68a   : > { %v2823_v61 = vpop.eup %2822 }
 0x68b   : > { %2475 = vst.msk [vmem:[%s368_s14] sm:$0x1] %vm2474_vm6, %v2823_v61 }
 0x68c   : > { %2915 = shalt.err (!%p2912_p11)
}
 0x68d   : > { %s2916_s23 = scalar_lea.hbm %s3748_s24, 16  ;;  %s2920_s21 = scalar_lea.hbm %s3792_s9, 32 }
 0x68e   : > { %p2917_p0 = scmp.ne.s32.totalorder %s3748_s24, %s2916_s23  ;;  %p2921_p3 = scmp.lt.s32.totalorder %s3748_s24, %s3792_s9 }
 0x68f   : > { %p2922_p2 = scmp.lt.s32.totalorder %s2920_s21, %s2916_s23 }
 0x690   : > { %p2918_p1 = pnand %p2917_p0, %p3069_p5 }
 0x691   : > { %p2923_p4 = por %p2922_p2, %p2921_p3 }
 0x692   : > { %p2919_p13 = pneg %p2918_p1 }
 0x694   : > { %p2924_p10 = pnand %p2923_p4, %p2919_p13 }
 0x696   : > { %2927 = shalt.err (!%p2924_p10)
}
 0x697   : > { %2757 = dma.vmem_to_hbm [thread:$0]  (%p3069_p5), %s2490_s16, 16, %s3748_s24, %s2477_s26  }
 0x698 PF: > { %p2779_p12 = scmp.ge.s32.totalorder %s2970_s12, 2  ;;  %s2501_s17 = sand.u32 1, %s2958_s30  }
 0x699   : > { %p3803_p7 = scmp.ne.s32.totalorder %s3796_s20, 0  ;;  %s2502_s22 = scalar_lea.sflag [#allocation4], %s2501_s17 }
 0x69b   : > { %p2770_p6 = pnand %p2779_p12, %p3803_p7 }
 0x69d   : > { %p2771_p9 = pneg %p2770_p6 }
 0x69f   : > { %2953 = dma.done.wait (%p2771_p9), %s2502_s22, 16  }
 0x6a0   : > { %2955 = vsyncadd (%p2771_p9), %s2502_s22, 4294967280  ;;  %s3804_s25 = sld [smem:[#allocation12_spill]]  ;;  %p21_p8 = scmp.ge.s32.totalorder %s3056_s15, 4  }
 0x6a1   : > { %s3805_s30 = smov %s2962_s10  ;;  %s3806_s10 = smov %s2966_s11 }
 0x6a2   : > { %s3808_s12 = smov %s3056_s15  ;;  %23 = sbr.rel (!%p21_p8) target bundleno = 5 (0x5), region = 120 }
 0x6a6   : > { %s3807_s11 = smov %s3804_s25 }
 0x6a7   :  { %2506 = vsyncpa [#allocation3], 1 }
 0x6a8   :  { %2508 = vsyncpa [#allocation3 + $0x1], 1 }
 0x6a9   :  { %2509 = vsyncpa [#allocation6], 1 }
 0x6aa   :  { %2510 = vsyncpa [#allocation4], 1 }
 0x6ab   :  { %2512 = vsyncpa [#allocation4 + $0x1], 1 }

</bundles_post_ra>
